<compile_context>
chip_gen: v6e
topology: v6e:2x2x1
jax: 0.10.0
libtpu: 0.0.40
codegen_flags: <defaults>
</compile_context>

<pallas_src>
import functools

import jax
import jax.numpy as jnp
from jax.experimental import pallas as pl
from jax.experimental.pallas import tpu as pltpu

EPS = 1e-5


# ----------------------------------------------------------------------------
# Pallas kernel: fused 3x3 conv (stride 1, SAME) + per-channel affine + ReLU
#   - activations are flattened (H*W, C) slabs (C on lanes, rows on sublanes)
#   - kx taps folded into lanes in a VMEM scratch  -> 3 matmuls with K = 3*Cin
#   - zero padding handled in-kernel (pad rows zeroed + where-masked edges)
#   - supports multiple channel-group inputs (decoder: [unpooled, skip])
# ----------------------------------------------------------------------------
def _conv3x3_affine_kernel(*refs, H, W, cins, apply_relu, channels_first):
    n_in = len(cins)
    x_refs = refs[:n_in]
    w_ref, scale_ref, shift_ref, o_ref, xw_ref = refs[n_in:]
    HW = H * W
    cin_t = sum(cins)
    cout = w_ref.shape[-1]

    def zeros(shape):
        return jnp.zeros(shape, xw_ref.dtype)

    # --- zero only the pad regions of the slab (body rows are overwritten) ---
    if W == 1:
        # width-1 level: left/right groups are entirely padding.
        xw_ref[...] = zeros(xw_ref.shape)
    else:
        xw_ref[0:W, :] = zeros((W, 3 * cin_t))                   # top pad row
        xw_ref[W + HW:(H + 2) * W, :] = zeros((W, 3 * cin_t))    # bottom pad row
        xw_ref[W:W + 1, cin_t:2 * cin_t] = zeros((1, cin_t))     # left pad of pos 0
        xw_ref[W + HW - 1:W + HW, 2 * cin_t:3 * cin_t] = zeros((1, cin_t))

    if W > 1:
        r = jax.lax.broadcasted_iota(jnp.int32, (HW - 1, 1), 0)
        mask_l = (r % W) != (W - 1)       # zero where x[i-1] is a row's last col
        mask_r = ((r + 1) % W) != 0       # zero where x[i+1] is a row's first col

    # --- build the kx-folded im2col slab; group order (centre, left, right) ---
    off = 0
    for p in range(n_in):
        cp = cins[p]
        x = x_refs[p][0]                                          # (HW, cp) bf16
        xw_ref[W:W + HW, off:off + cp] = x                        # centre tap (kx=1)
        if W > 1:
            xs_l = x[:HW - 1, :]                                  # left tap (kx=0)
            xw_ref[W + 1:W + HW, cin_t + off:cin_t + off + cp] = jnp.where(
                mask_l, xs_l, jnp.zeros_like(xs_l))
            xs_r = x[1:HW, :]                                     # right tap (kx=2)
            xw_ref[W:W + HW - 1, 2 * cin_t + off:2 * cin_t + off + cp] = jnp.where(
                mask_r, xs_r, jnp.zeros_like(xs_r))
        off += cp

    # --- 3 MXU matmuls (K = 3*cin_t); ky taps are leading-row slices ---
    acc = jnp.dot(xw_ref[0:HW, :], w_ref[0],
                  preferred_element_type=jnp.float32)
    acc = acc + jnp.dot(xw_ref[W:W + HW, :], w_ref[1],
                        preferred_element_type=jnp.float32)
    acc = acc + jnp.dot(xw_ref[2 * W:2 * W + HW, :], w_ref[2],
                        preferred_element_type=jnp.float32)

    y = acc * scale_ref[...] + shift_ref[...]                     # f32 epilogue
    if apply_relu:
        y = jnp.maximum(y, 0.0)
    if channels_first:
        # lane-dense channels-first output (used by the 1-channel classifier)
        yt = y.reshape(cout, HW) if cout == 1 else jnp.transpose(y)
        o_ref[...] = yt.reshape(1, cout, HW).astype(o_ref.dtype)
    else:
        o_ref[...] = y.reshape(1, HW, cout).astype(o_ref.dtype)


def conv3x3_affine(xs, w, scale, shift, *, H, W, relu, channels_first=False):
    """Fused 3x3 SAME conv + per-channel affine (+ReLU).

    xs: (N, H*W, Cin) bf16 slab, or list of slabs (concatenated on channels).
    w:  (3, 3, sum(Cin), Cout) f32.  scale/shift: (Cout,) f32.
    Returns (N, H*W, Cout) bf16, or (N, Cout, H*W) f32 if channels_first.
    """
    if not isinstance(xs, (list, tuple)):
        xs = [xs]
    xs = list(xs)
    N, HW = xs[0].shape[0], xs[0].shape[1]
    assert HW == H * W
    cins = tuple(int(x.shape[2]) for x in xs)
    cin_t = sum(cins)
    cout = w.shape[-1]
    assert w.shape == (3, 3, cin_t, cout)

    # centre-first kx ordering so the big unmasked store is lane-aligned:
    # slab lane index = group*cin_t + c with groups (kx=1, kx=0, kx=2).
    w3 = jnp.concatenate([w[:, 1:2], w[:, 0:1], w[:, 2:3]], axis=1)
    w3 = w3.reshape(3, 3 * cin_t, cout).astype(jnp.bfloat16)

    out_dtype = jnp.float32 if channels_first else jnp.bfloat16
    out_shape = (N, cout, HW) if channels_first else (N, HW, cout)
    out_spec = (pl.BlockSpec((1, cout, HW), lambda n: (n, 0, 0))
                if channels_first else
                pl.BlockSpec((1, HW, cout), lambda n: (n, 0, 0)))

    in_specs = [pl.BlockSpec((1, HW, cp), lambda n: (n, 0, 0)) for cp in cins]
    in_specs += [
        pl.BlockSpec((3, 3 * cin_t, cout), lambda n: (0, 0, 0)),
        pl.BlockSpec((1, cout), lambda n: (0, 0)),
        pl.BlockSpec((1, cout), lambda n: (0, 0)),
    ]

    kern = functools.partial(_conv3x3_affine_kernel, H=H, W=W, cins=cins,
                             apply_relu=relu, channels_first=channels_first)
    return pl.pallas_call(
        kern,
        out_shape=jax.ShapeDtypeStruct(out_shape, out_dtype),
        grid_spec=pltpu.PrefetchScalarGridSpec(
            num_scalar_prefetch=0,
            grid=(N,),
            in_specs=in_specs,
            out_specs=out_spec,
            scratch_shapes=[pltpu.VMEM(((H + 2) * W, 3 * cin_t), jnp.bfloat16)],
        ),
        compiler_params=pltpu.CompilerParams(
            dimension_semantics=("parallel",),
            vmem_limit_bytes=32 * 1024 * 1024),
    )(*xs, w3,
      scale.reshape(1, cout).astype(jnp.float32),
      shift.reshape(1, cout).astype(jnp.float32))


# ----------------------------------------------------------------------------
# Pooling glue (plain JAX, on flattened (N, H*W, C) activations)
# TODO(synk): fuse these into the encoder/decoder Pallas kernels.
# ----------------------------------------------------------------------------
def maxpool2x2_argmax(x2d, H, W):
    N, HW, C = x2d.shape
    xw = x2d.reshape(N, H // 2, 2, W // 2, 2, C).transpose(0, 1, 3, 2, 4, 5)
    xw = xw.reshape(N, H // 2, W // 2, 4, C)
    pooled = jnp.max(xw, axis=3)
    idx = jnp.argmax(xw, axis=3)                 # first-max tie break (PyTorch)
    return pooled.reshape(N, (H // 2) * (W // 2), C), idx


def max_unpool2x2(x2d, idx, h, w):
    N, hw, C = x2d.shape
    xs = x2d.reshape(N, h, w, C)
    onehot = (idx[:, :, :, None, :] ==
              jnp.arange(4)[None, None, None, :, None]).astype(xs.dtype)
    y = xs[:, :, :, None, :] * onehot                             # (N,h,w,4,C)
    y = y.reshape(N, h, w, 2, 2, C).transpose(0, 1, 3, 2, 4, 5)
    return y.reshape(N, (2 * h) * (2 * w), C)


# ----------------------------------------------------------------------------
# Deterministic parameter construction (BN folded, eval mode)
# ----------------------------------------------------------------------------
def init_conv(key, cin, cout):
    kw, kb = jax.random.split(key)
    bound = (cin * 9) ** -0.5
    w = jax.random.uniform(kw, (3, 3, cin, cout), jnp.float32, -bound, bound)
    b = jax.random.uniform(kb, (cout,), jnp.float32, -bound, bound)
    return w, b


def init_basic(key, cin, cout):
    kc, kg, kb = jax.random.split(key, 3)
    w, b = init_conv(kc, cin, cout)
    gamma = jax.random.uniform(kg, (cout,), jnp.float32, 0.5, 1.5)
    beta = 0.1 * jax.random.normal(kb, (cout,), jnp.float32)
    running_mean = jnp.zeros((cout,), jnp.float32)
    running_var = jnp.ones((cout,), jnp.float32)
    scale = gamma / jnp.sqrt(running_var + EPS)
    shift = beta + (b - running_mean) * scale
    return {'w': w, 'scale': scale, 'shift': shift}


def make_params(key, in_ch, out_ch, norm_ch=64):
    ks = jax.random.split(key, 11)
    w1, b1 = init_conv(ks[0], in_ch, norm_ch)
    wc, bc = init_conv(ks[1], norm_ch, out_ch)
    return {
        'conv1': {'w': w1, 'b': b1},
        'enc1': init_basic(ks[2], norm_ch, norm_ch),
        'enc2': init_basic(ks[3], norm_ch, norm_ch),
        'enc3': init_basic(ks[4], norm_ch, norm_ch),
        'enc4': init_basic(ks[5], norm_ch, norm_ch),
        'bottleneck': init_basic(ks[6], norm_ch, norm_ch),
        'dec1': init_basic(ks[7], 2 * norm_ch, norm_ch),
        'dec2': init_basic(ks[8], 2 * norm_ch, norm_ch),
        'dec3': init_basic(ks[9], 2 * norm_ch, norm_ch),
        'dec4': init_basic(ks[10], 2 * norm_ch, norm_ch),
        'cls': {'w': wc, 'b': bc},
    }


# ----------------------------------------------------------------------------
# XLA reference conv (same bf16 inputs / f32 accumulation / bf16 round trips)
# ----------------------------------------------------------------------------
def conv3x3_ref(xs, w, scale, shift, *, H, W, relu, channels_first=False):
    if not isinstance(xs, (list, tuple)):
        xs = [xs]
    x2d = jnp.concatenate(list(xs), axis=-1) if len(xs) > 1 else xs[0]
    N, HW, Cin = x2d.shape
    x_nhwc = x2d.reshape(N, H, W, Cin).astype(jnp.bfloat16)
    y = jax.lax.conv_general_dilated(
        x_nhwc, w.astype(jnp.bfloat16), (1, 1), 'SAME',
        dimension_numbers=('NHWC', 'HWIO', 'NHWC'),
        preferred_element_type=jnp.float32)
    y = y * scale + shift
    if relu:
        y = jnp.maximum(y, 0.0)
    cout = w.shape[-1]
    if channels_first:
        return jnp.transpose(y.reshape(N, HW, cout), (0, 2, 1))   # f32
    return y.reshape(N, HW, cout).astype(jnp.bfloat16)


# ----------------------------------------------------------------------------
# ConfidenceNet forward (NCHW in / NCHW out, like the PyTorch module)
# ----------------------------------------------------------------------------
def _forward(params, x_nchw, conv_fn):
    N, Cin, H, W = x_nchw.shape
    x2d = jnp.transpose(x_nchw, (0, 2, 3, 1)).reshape(N, H * W, Cin)
    x2d = x2d.astype(jnp.bfloat16)

    def basic(p, xs, h, w):
        return conv_fn(xs, p['w'], p['scale'], p['shift'], H=h, W=w, relu=True)

    def encoder(p, t, h, w):
        out = basic(p, t, h, w)
        e, idx = maxpool2x2_argmax(out, h, w)
        return e, out, idx

    def decoder(p, t, skip, idx, h, w):
        up = max_unpool2x2(t, idx, h, w)
        # unpooled + skip as two lane groups; no HBM concat round trip.
        return basic(p, [up, skip], 2 * h, 2 * w)

    c1 = params['conv1']
    tmp = conv_fn(x2d, c1['w'], jnp.ones_like(c1['b']), c1['b'],
                  H=H, W=W, relu=False)
    e1, out1, i1 = encoder(params['enc1'], tmp, H, W)             # 16 -> 8
    e2, out2, i2 = encoder(params['enc2'], e1, H // 2, W // 2)    # 8  -> 4
    e3, out3, i3 = encoder(params['enc3'], e2, H // 4, W // 4)    # 4  -> 2
    e4, out4, i4 = encoder(params['enc4'], e3, H // 8, W // 8)    # 2  -> 1
    bn = basic(params['bottleneck'], e4, H // 16, W // 16)
    d4 = decoder(params['dec4'], bn, out4, i4, H // 16, W // 16)
    d3 = decoder(params['dec3'], d4, out3, i3, H // 8, W // 8)
    d2 = decoder(params['dec2'], d3, out2, i2, H // 4, W // 4)
    d1 = decoder(params['dec1'], d2, out1, i1, H // 2, W // 2)
    cls = params['cls']
    out_cf = conv_fn(d1, cls['w'], jnp.ones_like(cls['b']), cls['b'],
                     H=H, W=W, relu=False, channels_first=True)   # (N, Cout, HW)
    out_ch = cls['w'].shape[-1]
    return out_cf.reshape(N, out_ch, H, W).astype(jnp.float32)    # NCHW


def confidence_net_forward(params, x_nchw):
    return _forward(params, x_nchw, conv3x3_affine)


def confidence_net_reference(params, x_nchw):
    return _forward(params, x_nchw, conv3x3_ref)


if __name__ == "__main__":
    key = jax.random.PRNGKey(0)
    kx, kp, kt, ku = jax.random.split(key, 4)

    N, IN_CH, H, W, OUT_CH = 2, 4, 16, 16, 1
    x_nchw = jax.random.normal(kx, (N, IN_CH, H, W), jnp.float32)  # PyTorch layout
    params = make_params(kp, IN_CH, OUT_CH)

    # Unit check 1: fused 64-ch conv+BN+ReLU block vs XLA conv (K=3*64 path).
    t = jax.random.normal(kt, (N, H * W, 64), jnp.float32).astype(jnp.bfloat16)
    p = params['enc1']
    got = conv3x3_affine(t, p['w'], p['scale'], p['shift'], H=H, W=W, relu=True)
    want = conv3x3_ref(t, p['w'], p['scale'], p['shift'], H=H, W=W, relu=True)
    assert jnp.allclose(got.astype(jnp.float32), want.astype(jnp.float32),
                        atol=2e-2, rtol=2e-2)

    # Unit check 2: two-input (unpooled ++ skip on lanes) decoder conv block.
    u = jax.random.normal(ku, (N, H * W, 64), jnp.float32).astype(jnp.bfloat16)
    pd = params['dec1']
    got2 = conv3x3_affine([u, t], pd['w'], pd['scale'], pd['shift'],
                          H=H, W=W, relu=True)
    want2 = conv3x3_ref([u, t], pd['w'], pd['scale'], pd['shift'],
                        H=H, W=W, relu=True)
    assert jnp.allclose(got2.astype(jnp.float32), want2.astype(jnp.float32),
                        atol=2e-2, rtol=2e-2)

    # End-to-end check vs XLA reference with identical bf16 inter-layer casts
    # (loose tolerance: rare bf16 rounding flips can move a pool argmax).
    out = jax.jit(confidence_net_forward)(params, x_nchw)
    out = jax.block_until_ready(out)
    ref = jax.jit(confidence_net_reference)(params, x_nchw)
    ref = jax.block_until_ready(ref)
    assert out.shape == (N, OUT_CH, H, W)
    assert jnp.allclose(out, ref, atol=1e-1, rtol=1e-1)
    print("KERNEL_OK")
</pallas_src>

<mosaic_0001>
module attributes {stable_mosaic.version = 11 : i64} {
  func.func @_conv3x3_affine_kernel(%arg0: i32, %arg1: memref<1x256x64xbf16, #tpu.memory_space<vmem>>, %arg2: memref<3x192x64xbf16, #tpu.memory_space<vmem>>, %arg3: memref<1x64xf32, #tpu.memory_space<vmem>>, %arg4: memref<1x64xf32, #tpu.memory_space<vmem>>, %arg5: memref<1x256x64xbf16, #tpu.memory_space<vmem>>, %arg6: memref<288x192xbf16, #tpu.memory_space<vmem>>) attributes {dimension_semantics = [#tpu.dimension_semantics<parallel>], iteration_bounds = array<i64: 2>, scalar_prefetch = 0 : i64, scratch_operands = 1 : i64, tpu.core_type = #tpu.core_type<tc>, window_params = [{transform_indices = @transform_0, window_bounds = array<i64: 1, 256, 64>}, {pipeline_mode = #tpu.pipeline_mode<synchronous>, transform_indices = @transform_1, window_bounds = array<i64: 3, 192, 64>}, {pipeline_mode = #tpu.pipeline_mode<synchronous>, transform_indices = @transform_2, window_bounds = array<i64: 1, 64>}, {pipeline_mode = #tpu.pipeline_mode<synchronous>, transform_indices = @transform_3, window_bounds = array<i64: 1, 64>}, {transform_indices = @transform_4, window_bounds = array<i64: 1, 256, 64>}]} {
    %cst = arith.constant 0.000000e+00 : bf16
    %0 = vector.broadcast %cst : bf16 to vector<16x192xbf16>
    %c0 = arith.constant 0 : index
    %c0_0 = arith.constant 0 : index
    %1 = vector.load %arg6[%c0, %c0_0] : memref<288x192xbf16, #tpu.memory_space<vmem>>, vector<16x192xbf16>
    tpu.vector_store %arg6[%c0, %c0_0], %0 {strides = array<i32>} : memref<288x192xbf16, #tpu.memory_space<vmem>>, vector<16x192xbf16>,
    %cst_1 = arith.constant 0.000000e+00 : bf16
    %2 = vector.broadcast %cst_1 : bf16 to vector<16x192xbf16>
    %c272 = arith.constant 272 : index
    %c0_2 = arith.constant 0 : index
    %3 = vector.load %arg6[%c272, %c0_2] : memref<288x192xbf16, #tpu.memory_space<vmem>>, vector<16x192xbf16>
    tpu.vector_store %arg6[%c272, %c0_2], %2 {strides = array<i32>} : memref<288x192xbf16, #tpu.memory_space<vmem>>, vector<16x192xbf16>,
    %cst_3 = arith.constant 0.000000e+00 : bf16
    %4 = vector.broadcast %cst_3 : bf16 to vector<1x64xbf16>
    %c16 = arith.constant 16 : index
    %c64 = arith.constant 64 : index
    %5 = vector.load %arg6[%c16, %c64] : memref<288x192xbf16, #tpu.memory_space<vmem>>, vector<1x64xbf16>
    tpu.vector_store %arg6[%c16, %c64], %4 {strides = array<i32>} : memref<288x192xbf16, #tpu.memory_space<vmem>>, vector<1x64xbf16>,
    %cst_4 = arith.constant 0.000000e+00 : bf16
    %6 = vector.broadcast %cst_4 : bf16 to vector<1x64xbf16>
    %c271 = arith.constant 271 : index
    %c128 = arith.constant 128 : index
    %7 = vector.load %arg6[%c271, %c128] : memref<288x192xbf16, #tpu.memory_space<vmem>>, vector<1x64xbf16>
    tpu.vector_store %arg6[%c271, %c128], %6 {strides = array<i32>} : memref<288x192xbf16, #tpu.memory_space<vmem>>, vector<1x64xbf16>,
    %8 = tpu.iota {dimensions = array<i32: 0>} : vector<255x1xi32>
    %c16_i32 = arith.constant 16 : i32
    %c0_i32 = arith.constant 0 : i32
    %9 = arith.cmpi eq, %c16_i32, %c0_i32 : i32
    %c1_i32 = arith.constant 1 : i32
    %10 = arith.select %9, %c1_i32, %c16_i32 : i32
    %11 = vector.broadcast %10 : i32 to vector<255x1xi32>
    %12 = arith.remsi %8, %11 : vector<255x1xi32>
    %c0_i32_5 = arith.constant 0 : i32
    %13 = vector.broadcast %c0_i32_5 : i32 to vector<255x1xi32>
    %14 = arith.cmpi ne, %12, %13 : vector<255x1xi32>
    %c0_i32_6 = arith.constant 0 : i32
    %15 = vector.broadcast %c0_i32_6 : i32 to vector<255x1xi32>
    %16 = arith.cmpi slt, %12, %15 : vector<255x1xi32>
    %c0_i32_7 = arith.constant 0 : i32
    %17 = arith.cmpi slt, %10, %c0_i32_7 : i32
    %18 = vector.broadcast %17 : i1 to vector<255x1xi1>
    %19 = vector.broadcast %18 : vector<255x1xi1> to vector<255x1xi1>
    %20 = arith.xori %16, %19 : vector<255x1xi1>
    %21 = arith.andi %20, %14 : vector<255x1xi1>
    %22 = vector.broadcast %10 : i32 to vector<255x1xi32>
    %23 = arith.addi %12, %22 : vector<255x1xi32>
    %24 = arith.select %21, %23, %12 : vector<255x1xi1>, vector<255x1xi32>
    %c15_i32 = arith.constant 15 : i32
    %25 = vector.broadcast %c15_i32 : i32 to vector<255x1xi32>
    %26 = arith.cmpi ne, %24, %25 : vector<255x1xi32>
    %c1_i32_8 = arith.constant 1 : i32
    %27 = vector.broadcast %c1_i32_8 : i32 to vector<255x1xi32>
    %28 = arith.addi %8, %27 : vector<255x1xi32>
    %c16_i32_9 = arith.constant 16 : i32
    %c0_i32_10 = arith.constant 0 : i32
    %29 = arith.cmpi eq, %c16_i32_9, %c0_i32_10 : i32
    %c1_i32_11 = arith.constant 1 : i32
    %30 = arith.select %29, %c1_i32_11, %c16_i32_9 : i32
    %31 = vector.broadcast %30 : i32 to vector<255x1xi32>
    %32 = arith.remsi %28, %31 : vector<255x1xi32>
    %c0_i32_12 = arith.constant 0 : i32
    %33 = vector.broadcast %c0_i32_12 : i32 to vector<255x1xi32>
    %34 = arith.cmpi ne, %32, %33 : vector<255x1xi32>
    %c0_i32_13 = arith.constant 0 : i32
    %35 = vector.broadcast %c0_i32_13 : i32 to vector<255x1xi32>
    %36 = arith.cmpi slt, %32, %35 : vector<255x1xi32>
    %c0_i32_14 = arith.constant 0 : i32
    %37 = arith.cmpi slt, %30, %c0_i32_14 : i32
    %38 = vector.broadcast %37 : i1 to vector<255x1xi1>
    %39 = vector.broadcast %38 : vector<255x1xi1> to vector<255x1xi1>
    %40 = arith.xori %36, %39 : vector<255x1xi1>
    %41 = arith.andi %40, %34 : vector<255x1xi1>
    %42 = vector.broadcast %30 : i32 to vector<255x1xi32>
    %43 = arith.addi %32, %42 : vector<255x1xi32>
    %44 = arith.select %41, %43, %32 : vector<255x1xi1>, vector<255x1xi32>
    %c0_i32_15 = arith.constant 0 : i32
    %45 = vector.broadcast %c0_i32_15 : i32 to vector<255x1xi32>
    %46 = arith.cmpi ne, %44, %45 : vector<255x1xi32>
    %c0_16 = arith.constant 0 : index
    %c0_17 = arith.constant 0 : index
    %c0_18 = arith.constant 0 : index
    %47 = vector.load %arg1[%c0_16, %c0_17, %c0_18] : memref<1x256x64xbf16, #tpu.memory_space<vmem>>, vector<1x256x64xbf16>
    %48 = vector.shape_cast %47 : vector<1x256x64xbf16> to vector<256x64xbf16>
    %c16_19 = arith.constant 16 : index
    %c0_20 = arith.constant 0 : index
    %49 = vector.load %arg6[%c16_19, %c0_20] : memref<288x192xbf16, #tpu.memory_space<vmem>>, vector<256x64xbf16>
    tpu.vector_store %arg6[%c16_19, %c0_20], %48 {strides = array<i32>} : memref<288x192xbf16, #tpu.memory_space<vmem>>, vector<256x64xbf16>,
    %50 = vector.extract_strided_slice %48 {offsets = [0, 0], sizes = [255, 64], strides = [1, 1]} : vector<256x64xbf16> to vector<255x64xbf16>
    %cst_21 = arith.constant 0.000000e+00 : bf16
    %51 = vector.broadcast %cst_21 : bf16 to vector<255x64xbf16>
    %52 = vector.shape_cast %26 : vector<255x1xi1> to vector<255x1xi1>
    %53 = vector.broadcast %52 : vector<255x1xi1> to vector<255x64xi1>
    %54 = arith.select %53, %50, %51 : vector<255x64xi1>, vector<255x64xbf16>
    %c17 = arith.constant 17 : index
    %c64_22 = arith.constant 64 : index
    %55 = vector.load %arg6[%c17, %c64_22] : memref<288x192xbf16, #tpu.memory_space<vmem>>, vector<255x64xbf16>
    tpu.vector_store %arg6[%c17, %c64_22], %54 {strides = array<i32>} : memref<288x192xbf16, #tpu.memory_space<vmem>>, vector<255x64xbf16>,
    %56 = vector.extract_strided_slice %48 {offsets = [1, 0], sizes = [255, 64], strides = [1, 1]} : vector<256x64xbf16> to vector<255x64xbf16>
    %cst_23 = arith.constant 0.000000e+00 : bf16
    %57 = vector.broadcast %cst_23 : bf16 to vector<255x64xbf16>
    %58 = vector.shape_cast %46 : vector<255x1xi1> to vector<255x1xi1>
    %59 = vector.broadcast %58 : vector<255x1xi1> to vector<255x64xi1>
    %60 = arith.select %59, %56, %57 : vector<255x64xi1>, vector<255x64xbf16>
    %c16_24 = arith.constant 16 : index
    %c128_25 = arith.constant 128 : index
    %61 = vector.load %arg6[%c16_24, %c128_25] : memref<288x192xbf16, #tpu.memory_space<vmem>>, vector<255x64xbf16>
    tpu.vector_store %arg6[%c16_24, %c128_25], %60 {strides = array<i32>} : memref<288x192xbf16, #tpu.memory_space<vmem>>, vector<255x64xbf16>,
    %c0_26 = arith.constant 0 : index
    %c0_27 = arith.constant 0 : index
    %62 = vector.load %arg6[%c0_26, %c0_27] : memref<288x192xbf16, #tpu.memory_space<vmem>>, vector<256x192xbf16>
    %c0_28 = arith.constant 0 : index
    %c0_29 = arith.constant 0 : index
    %c0_30 = arith.constant 0 : index
    %63 = vector.load %arg2[%c0_28, %c0_29, %c0_30] : memref<3x192x64xbf16, #tpu.memory_space<vmem>>, vector<1x192x64xbf16>
    %64 = vector.shape_cast %63 : vector<1x192x64xbf16> to vector<192x64xbf16>
    %cst_31 = arith.constant dense<0.000000e+00> : vector<256x64xf32>
    %65 = tpu.matmul %62, %64, %cst_31 {dimension_numbers = #tpu.dot_dimension_numbers<[1], [0], [0], [1], [0, 0, 1, 1], [], []>} : vector<256x192xbf16>, vector<192x64xbf16>, vector<256x64xf32> -> vector<256x64xf32>
    %c16_32 = arith.constant 16 : index
    %c0_33 = arith.constant 0 : index
    %66 = vector.load %arg6[%c16_32, %c0_33] : memref<288x192xbf16, #tpu.memory_space<vmem>>, vector<256x192xbf16>
    %c1 = arith.constant 1 : index
    %c0_34 = arith.constant 0 : index
    %c0_35 = arith.constant 0 : index
    %67 = vector.load %arg2[%c1, %c0_34, %c0_35] : memref<3x192x64xbf16, #tpu.memory_space<vmem>>, vector<1x192x64xbf16>
    %68 = vector.shape_cast %67 : vector<1x192x64xbf16> to vector<192x64xbf16>
    %cst_36 = arith.constant dense<0.000000e+00> : vector<256x64xf32>
    %69 = tpu.matmul %66, %68, %cst_36 {dimension_numbers = #tpu.dot_dimension_numbers<[1], [0], [0], [1], [0, 0, 1, 1], [], []>} : vector<256x192xbf16>, vector<192x64xbf16>, vector<256x64xf32> -> vector<256x64xf32>
    %70 = arith.addf %65, %69 : vector<256x64xf32>
    %c32 = arith.constant 32 : index
    %c0_37 = arith.constant 0 : index
    %71 = vector.load %arg6[%c32, %c0_37] : memref<288x192xbf16, #tpu.memory_space<vmem>>, vector<256x192xbf16>
    %c2 = arith.constant 2 : index
    %c0_38 = arith.constant 0 : index
    %c0_39 = arith.constant 0 : index
    %72 = vector.load %arg2[%c2, %c0_38, %c0_39] : memref<3x192x64xbf16, #tpu.memory_space<vmem>>, vector<1x192x64xbf16>
    %73 = vector.shape_cast %72 : vector<1x192x64xbf16> to vector<192x64xbf16>
    %cst_40 = arith.constant dense<0.000000e+00> : vector<256x64xf32>
    %74 = tpu.matmul %71, %73, %cst_40 {dimension_numbers = #tpu.dot_dimension_numbers<[1], [0], [0], [1], [0, 0, 1, 1], [], []>} : vector<256x192xbf16>, vector<192x64xbf16>, vector<256x64xf32> -> vector<256x64xf32>
    %75 = arith.addf %70, %74 : vector<256x64xf32>
    %c0_41 = arith.constant 0 : index
    %c0_42 = arith.constant 0 : index
    %76 = vector.load %arg3[%c0_41, %c0_42] : memref<1x64xf32, #tpu.memory_space<vmem>>, vector<1x64xf32>
    %77 = vector.broadcast %76 : vector<1x64xf32> to vector<256x64xf32>
    %78 = arith.mulf %75, %77 : vector<256x64xf32>
    %c0_43 = arith.constant 0 : index
    %c0_44 = arith.constant 0 : index
    %79 = vector.load %arg4[%c0_43, %c0_44] : memref<1x64xf32, #tpu.memory_space<vmem>>, vector<1x64xf32>
    %80 = vector.broadcast %79 : vector<1x64xf32> to vector<256x64xf32>
    %81 = arith.addf %78, %80 : vector<256x64xf32>
    %cst_45 = arith.constant 0.000000e+00 : f32
    %82 = vector.broadcast %cst_45 : f32 to vector<256x64xf32>
    %83 = arith.maximumf %81, %82 : vector<256x64xf32>
    %84 = vector.shape_cast %83 : vector<256x64xf32> to vector<1x256x64xf32>
    %85 = arith.truncf %84 : vector<1x256x64xf32> to vector<1x256x64xbf16>
    %c0_46 = arith.constant 0 : index
    %c0_47 = arith.constant 0 : index
    %c0_48 = arith.constant 0 : index
    %86 = vector.load %arg5[%c0_46, %c0_47, %c0_48] : memref<1x256x64xbf16, #tpu.memory_space<vmem>>, vector<1x256x64xbf16>
    tpu.vector_store %arg5[%c0_46, %c0_47, %c0_48], %85 {strides = array<i32>} : memref<1x256x64xbf16, #tpu.memory_space<vmem>>, vector<1x256x64xbf16>,
    return
  }
  func.func @transform_0(%arg0: i32) -> (i32, i32, i32) {
    %c0_i32 = arith.constant 0 : i32
    %c0_i32_0 = arith.constant 0 : i32
    %c0_i32_1 = arith.constant 0 : i32
    return %arg0, %c0_i32, %c0_i32_0 : i32, i32, i32
  }
  func.func @transform_1(%arg0: i32) -> (i32, i32, i32) {
    %c0_i32 = arith.constant 0 : i32
    %c0_i32_0 = arith.constant 0 : i32
    %c0_i32_1 = arith.constant 0 : i32
    %c0_i32_2 = arith.constant 0 : i32
    return %c0_i32, %c0_i32_0, %c0_i32_1 : i32, i32, i32
  }
  func.func @transform_2(%arg0: i32) -> (i32, i32) {
    %c0_i32 = arith.constant 0 : i32
    %c0_i32_0 = arith.constant 0 : i32
    %c0_i32_1 = arith.constant 0 : i32
    return %c0_i32, %c0_i32_0 : i32, i32
  }
  func.func @transform_3(%arg0: i32) -> (i32, i32) {
    %c0_i32 = arith.constant 0 : i32
    %c0_i32_0 = arith.constant 0 : i32
    %c0_i32_1 = arith.constant 0 : i32
    return %c0_i32, %c0_i32_0 : i32, i32
  }
  func.func @transform_4(%arg0: i32) -> (i32, i32, i32) {
    %c0_i32 = arith.constant 0 : i32
    %c0_i32_0 = arith.constant 0 : i32
    %c0_i32_1 = arith.constant 0 : i32
    return %arg0, %c0_i32, %c0_i32_0 : i32, i32, i32
  }
}

</mosaic_0001>

<bundles_post_ra>
// kernel: tpu_custom_call.1
= control target key start
LH: loop header
LB: loop body
LE: loop exit
PB: predicated region body
PF: predicated region fallthrough
CT: control target
= control target key end

     0   :  { %s4621_s15 = smov 0   ;;  %s6117_s0 = inlined_call_operand.vmem [shape: bf16[2,256,64], index: 0, kind: input, shape index: {}]   ;;  %s6118_s1 = inlined_call_operand.vmem [shape: bf16[3,192,64], index: 1, kind: input, shape index: {}]   ;;  %s6119_s2 = inlined_call_operand.vmem [shape: f32[1,64], index: 2, kind: input, shape index: {}]   ;;  %s6120_s3 = inlined_call_operand.vmem [shape: f32[1,64], index: 3, kind: input, shape index: {}]   ;;  %s6121_s4 = inlined_call_operand.vmem [shape: bf16[2,256,64], index: 4, kind: output, shape index: {}]  }
   0x1 LB: > { %s4193_s16 = sadd.s32 4294967295, %s4591_s15   ;;  %p4197_p0 = scmp.ge.s32.totalorder %s4591_s15, 1  ;;  %s4591_s15 = sphi %s4621_s15, %s14_s15  }
   0x2   : > { %p162_p1 = scmp.lt.s32.totalorder %s4591_s15, 3 }
   0x4   : > { %p163_p2 = pnand %p4197_p0, %p162_p1 }
   0x5   : > { %p188_p3 = scmp.lt.s32.totalorder (!%p163_p2), %s4193_s16, 1  ;;  %s4595_s21 = smov (!%p163_p2), 64  }
   0x6   : > { %166 = sbr.rel (%p163_p2) target bundleno = 666 (0x29a), region = 36 }
   0xb   : > { %v220_v0 = vlaneseq  ;;  %vm4593_vm0 = vmmov 1   ;;  %v4594_v2 = vmov 0   ;;  %s6141_s16 = smov (!%p188_p3, %s4193_s16), 1  ;;  %vm1149_vm2 = vcmask 519168  }
   0xc   : > { %vm4629_vm1 = vmpackc.low %vm4593_vm0, %vm4593_vm0  ;;  %2948 = vmatprep.subr.bf16.mxu0 %v4594_v2  ;;  %4470 = vmatprep.subr.bf16.mxu1 %v4594_v2  ;;  %vm209_vm3 = vsmask.f32 256  ;;  %vm1310_vm4 = vsmask.f32 4368  ;;  %s4436_s17 = sshll.u32 %s6141_s16, 7 }
   0xd   : > { %v1828_v3 = vsel %vm4629_vm1, 65537, %v4594_v2  ;;  %v4640_v4 = vshrl.u32 %v220_v0, 7  ;;  %s4656_s20 = scalar_lea.vmem %s6117_s0, %s4436_s17  ;;  %vm4750_vm12 = vmor %vm209_vm3, %vm1310_vm4  ;;  %vm2210_vm0 = vsmask.f32 3328  ;;  %vm2211_vm4 = vsmask.f32 7440  ;;  %s5958_s5 = scalar_lea.vmem %s6121_s4, %s4436_s17 }
   0xe   : > { %v1861_v5 = vshrl.u32 %v1828_v3, 16  ;;  %v1864_v6 = vshll.u32 %v1828_v3, 16  ;;  %v4668_v15 = vld [vmem:[%s4656_s20] sm:$0xf]  ;;  %v4671_v18 = vld [vmem:[%s4656_s20 + $0x3c] sm:$0xf] }
   0xf   : > { %v236_v7 = vadd.s32 120, %v4640_v4  ;;  %v222_v8 = vadd.s32 8, %v4640_v4  ;;  %v4646_v9 = vadd.s32 136, %v4640_v4  ;;  %v4649_v10 = vadd.s32 152, %v4640_v4  ;;  %v4681_v22 = vld [vmem:[%s4656_s20 + $0x40] sm:$0xf] }
  0x10   : > { %v1863_v11 = vrot.slane %v1861_v5, 7  ;;  %v4659_v12 = vadd.s32 24, %v4640_v4  ;;  %v4662_v13 = vadd.s32 168, %v4640_v4  ;;  %v4665_v14 = vadd.s32 40, %v4640_v4  ;;  %1165 = vst.msk [vmem:[#allocation2 + $0x88] sm:$0xf] %vm1149_vm2, %v4671_v18 }
  0x11   : > { %v362_v16 = vand.u32 15, %v236_v7  ;;  %v684_v17 = vadd.s32 1, %v236_v7  ;;  %v1278_v19 = vsel %vm4629_vm1, %v4668_v15, 0  ;;  %v264_v23 = vand.u32 15, %v222_v8  ;;  %1166 = vst.msk [vmem:[#allocation2 + $0x90] sm:$0xf] %vm1149_vm2, %v4681_v22 }
  0x12   : > { %v4676_v20 = vor.u32 %v1864_v6, %v1863_v11  ;;  %v4678_v21 = vrot.slane %v1863_v11, 4  ;;  %v1313_v24 = vshrl.u32 %v1278_v19, 16  ;;  %v1316_v25 = vshll.u32 %v1278_v19, 16  ;;  %v4688_v27 = vld [vmem:[%s4656_s20 + $0x4] sm:$0xf] }
  0x13   : > { %vm652_vm5 = vcmp.ne.s32.totalorder %v362_v16, 15  ;;  %v810_v26 = vand.u32 15, %v684_v17  ;;  %v1294_v28 = vsel %vm4629_vm1, %v4681_v22, 0  ;;  %vm4694_vm8 = vcmp.ne.s32.totalorder %v264_v23, 15  ;;  %1151 = vst.msk [vmem:[#allocation2 + $0x18] sm:$0xf] %vm1149_vm2, %v4688_v27 }
  0x14   : > { %vm2146_vm6 = vcmp.ne.s16.totalorder %v4676_v20, 0  ;;  %vm1261_vm7 = vmpackc.low %vm652_vm5, %vm652_vm5  ;;  %v670_v30 = vadd.s32 1, %v222_v8  ;;  %v4701_v31 = vld [vmem:[%s4656_s20 + $0x44] sm:$0xf]  ;;  %v4703_v32 = vrot.slane %v1313_v24, 7  ;;  %v1456_v40 = vshrl.u32 %v1294_v28, 16 }
  0x15   : > { %v2178_v33 = vsel %vm2146_vm6, %v4668_v15, 0  ;;  %vm4706_vm9 = vcmp.ne.s32.totalorder %v810_v26, 0  ;;  %v4711_v35 = vsel %vm1261_vm7, %v4671_v18, 0  ;;  %vm1247_vm10 = vmpackc.low %vm4694_vm8, %vm4694_vm8  ;;  %1167 = vst.msk [vmem:[#allocation2 + $0x98] sm:$0xf] %vm1149_vm2, %v4701_v31  ;;  %v1459_v44 = vshll.u32 %v1294_v28, 16 }
  0x16   : > { %v4719_v36 = vld [vmem:[%s4656_s20 + $0x48] sm:$0xf]  ;;  %v2214_v37 = vshrl.u32 %v2178_v33, 16  ;;  %v2217_v38 = vshll.u32 %v2178_v33, 16  ;;  %v1447_v39 = vshrl.u32 %v4711_v35, 16  ;;  %vm1811_vm11 = vmpackc.low %vm4706_vm9, %vm4706_vm9  ;;  %v1318_v42 = vor.u32 %v1316_v25, %v4703_v32 }
  0x17   : > { %1168 = vst.msk [vmem:[#allocation2 + $0xa0] sm:$0xf] %vm1149_vm2, %v4719_v36  ;;  %v4728_v41 = vld [vmem:[%s4656_s20 + $0x4c] sm:$0xf]  ;;  %v1319_v43 = vrot.slane %v4703_v32, 4  ;;  %v1843_v45 = vsel %vm1811_vm11, 65537, %v4594_v2  ;;  %vm4915_vm11 = vmor %vm2210_vm0, %vm2211_vm4 }
  0x18   : > { %1169 = vst.msk [vmem:[#allocation2 + $0xa8] sm:$0xf] %vm1149_vm2, %v4728_v41  ;;  %v4736_v46 = vld [vmem:[%s4656_s20 + $0x8] sm:$0xf]  ;;  %v2216_v47 = vrot.slane %v2214_v37, 4  ;;  %v2219_v48 = vrot.slane %v2217_v38, 5  ;;  %1598 = vrot.lane.b32.xlu1 %v1318_v42, %s4595_s21 }
  0x19   : > { %v4738_v49 = vrot.slane %v1447_v39, 7  ;;  %v4740_v50 = vrot.slane %v1456_v40, 7  ;;  %1152 = vst.msk [vmem:[#allocation2 + $0x20] sm:$0xf] %vm1149_vm2, %v4736_v46  ;;  %v4745_v51 = vld [vmem:[%s4656_s20 + $0xc] sm:$0xf] }
  0x1a   : > { %v1995_v53 = vshrl.u32 %v1843_v45, 16  ;;  %v1998_v54 = vshll.u32 %v1843_v45, 16  ;;  %v712_v55 = vand.u32 15, %v670_v30  ;;  %v1279_v56 = vsel %vm1247_vm10, %v4688_v27, 0  ;;  %1153 = vst.msk [vmem:[#allocation2 + $0x28] sm:$0xf] %vm1149_vm2, %v4745_v51 }
  0x1b   : > { %v4763_v57 = vld [vmem:[%s4656_s20 + $0x50] sm:$0xf]  ;;  %v2220_v58 = vor.u32 %v2219_v48, %v2216_v47  ;;  %v1454_v59 = vrot.slane %v4738_v49, 4  ;;  %v1461_v60 = vor.u32 %v1459_v44, %v4740_v50  ;;  %v1321_v61 = vshrl.u32 %v1279_v56, 16  ;;  %v4770_v62 = vld [vmem:[%s4656_s20 + $0x54] sm:$0xf] }
  0x1c   : > { %1170 = vst.msk [vmem:[#allocation2 + $0xb0] sm:$0xf] %vm1149_vm2, %v4763_v57  ;;  %v4773_v63 = vld [vmem:[%s4656_s20 + $0x10] sm:$0xf]  ;;  %v1997_v0 = vrot.slane %v1995_v53, 7  ;;  %vm4775_vm13 = vcmp.ne.s32.totalorder %v712_v55, 0 }
  0x1d   : > { %v1324_v5 = vshll.u32 %v1279_v56, 16  ;;  %v376_v6 = vand.u32 15, %v4646_v9  ;;  %1171 = vst.msk [vmem:[#allocation2 + $0xb8] sm:$0xf] %vm1149_vm2, %v4770_v62  ;;  %1154 = vst.msk [vmem:[#allocation2 + $0x30] sm:$0xf] %vm1149_vm2, %v4773_v63  ;;  %v1462_v11 = vsel %vm4750_vm12, %v1454_v59, %v1461_v60 }
  0x1e   : > { %v4785_v7 = vld [vmem:[%s4656_s20 + $0x14] sm:$0xf]  ;;  %v4787_v8 = vrot.slane %v2220_v58, 4  ;;  %v4791_v16 = vrot.slane %v1321_v61, 7  ;;  %vm1797_vm14 = vmpackc.low %vm4775_vm13, %vm4775_vm13  ;;  %v686_v17 = vadd.s32 1, %v4646_v9  ;;  %v2000_v23 = vor.u32 %v1998_v54, %v1997_v0  ;;  %1630 = vrot.lane.b32.xlu0 %v1462_v11, %s4595_s21 }
  0x1f   : > { %1155 = vst.msk [vmem:[#allocation2 + $0x38] sm:$0xf] %vm1149_vm2, %v4785_v7  ;;  %v4800_v19 = vld [vmem:[%s4656_s20 + $0x58] sm:$0xf]  ;;  %v2002_v24 = vrot.slane %v1997_v0, 4  ;;  %v1829_v25 = vsel %vm1797_vm14, 65537, %v4594_v2 }
  0x20   : > { %vm654_vm15 = vcmp.ne.s32.totalorder %v376_v6, 15  ;;  %1172 = vst.msk [vmem:[#allocation2 + $0xc0] sm:$0xf] %vm1149_vm2, %v4800_v19  ;;  %v4807_v26 = vld [vmem:[%s4656_s20 + $0x5c] sm:$0xf]  ;;  %v1326_v9 = vor.u32 %v1324_v5, %v4791_v16  ;;  %v1869_v28 = vshrl.u32 %v1829_v25, 16  ;;  %v2001_v34 = vsel %vm4750_vm12, %v4678_v21, %v2000_v23 }
  0x21   : > { %v1872_v29 = vshll.u32 %v1829_v25, 16  ;;  %v824_v30 = vand.u32 15, %v686_v17  ;;  %vm1263_vm5 = vmpackc.low %vm654_vm15, %vm654_vm15  ;;  %1173 = vst.msk [vmem:[#allocation2 + $0xc8] sm:$0xf] %vm1149_vm2, %v4807_v26  ;;  %v4813_v33 = vld [vmem:[%s4656_s20 + $0x18] sm:$0xf]  ;;  %v2010_v37 = vsel %vm4750_vm12, %v2002_v24, %v4676_v20 }
  0x22   : > { %v1295_v38 = vsel %vm1263_vm5, %v4701_v31, 0  ;;  %v1463_v39 = vrot.slane %v4740_v50, 4  ;;  %1156 = vst.msk [vmem:[#allocation2 + $0x40] sm:$0xf] %vm1149_vm2, %v4813_v33  ;;  %v4826_v40 = vld [vmem:[%s4656_s20 + $0x1c] sm:$0xf]  ;;  %v1327_v44 = vsel %vm4750_vm12, %v1319_v43, %v1326_v9 }
  0x23   : > { %v4829_v42 = vld [vmem:[%s4656_s20 + $0x60] sm:$0xf]  ;;  %vm2161_vm6 = vcmp.ne.s16.totalorder %v2001_v34, 0  ;;  %vm2162_vm7 = vcmp.ne.s16.totalorder %v2010_v37, 0  ;;  %v4835_v45 = vrot.slane %v1869_v28, 7  ;;  %1600 = vrot.lane.b32.xlu1 %v1327_v44, %s4595_s21  ;;  %vm1102_vm8 = vcmp.ne.s32.totalorder %v824_v30, 0 }
  0x24   : > { %1157 = vst.msk [vmem:[#allocation2 + $0x48] sm:$0xf] %vm1149_vm2, %v4826_v40  ;;  %1174 = vst.msk [vmem:[#allocation2 + $0xd0] sm:$0xf] %vm1149_vm2, %v4829_v42  ;;  %v4842_v47 = vld [vmem:[%s4656_s20 + $0x64] sm:$0xf] }
  0x25   : > { %v2193_v48 = vsel %vm2161_vm6, %v4671_v18, 0  ;;  %v2194_v50 = vsel %vm2162_vm7, %v4681_v22, 0  ;;  %v1465_v32 = vshrl.u32 %v1295_v38, 16  ;;  %1175 = vst.msk [vmem:[#allocation2 + $0xd8] sm:$0xf] %vm1149_vm2, %v4842_v47  ;;  %vm1813_vm9 = vmpackc.low %vm1102_vm8, %vm1102_vm8  ;;  %v1874_v22 = vor.u32 %v1872_v29, %v4835_v45 }
  0x26   : > { %v4850_v43 = vld [vmem:[%s4656_s20 + $0x20] sm:$0xf]  ;;  %v2363_v53 = vshll.u32 %v2193_v48, 16  ;;  %v2367_v54 = vshrl.u32 %v2193_v48, 16  ;;  %v2373_v55 = vshll.u32 %v2194_v50, 16  ;;  %v2377_v56 = vshrl.u32 %v2194_v50, 16 }
  0x27   : > { %1158 = vst.msk [vmem:[#allocation2 + $0x50] sm:$0xf] %vm1149_vm2, %v4850_v43  ;;  %v4855_v18 = vld [vmem:[%s4656_s20 + $0x24] sm:$0xf]  ;;  %v4858_v58 = vrot.slane %v1465_v32, 7  ;;  %v1468_v59 = vshll.u32 %v1295_v38, 16  ;;  %v1875_v17 = vsel %vm4750_vm12, %v4678_v21, %v1874_v22 }
  0x28   : > { %v1845_v60 = vsel %vm1813_vm9, 65537, %v4594_v2  ;;  %1159 = vst.msk [vmem:[#allocation2 + $0x58] sm:$0xf] %vm1149_vm2, %v4855_v18  ;;  %v4864_v61 = vld [vmem:[%s4656_s20 + $0x68] sm:$0xf]  ;;  %v4866_v0 = vrot.slane %v2363_v53, 5 }
  0x29   : > { %v2369_v3 = vrot.slane %v2367_v54, 4  ;;  %v2375_v5 = vrot.slane %v2373_v55, 5  ;;  %v2379_v6 = vrot.slane %v2377_v56, 4  ;;  %1176 = vst.msk [vmem:[#allocation2 + $0xe0] sm:$0xf] %vm1149_vm2, %v4864_v61  ;;  %v1470_v23 = vor.u32 %v1468_v59, %v4858_v58 }
  0x2a   : > { %v4871_v11 = vld [vmem:[%s4656_s20 + $0x6c] sm:$0xf]  ;;  %v2013_v24 = vshrl.u32 %v1845_v60, 16  ;;  %v2016_v25 = vshll.u32 %v1845_v60, 16  ;;  %v4880_v9 = vld [vmem:[%s4656_s20 + $0x28] sm:$0xf] }
  0x2b   : > { %1177 = vst.msk [vmem:[#allocation2 + $0xe8] sm:$0xf] %vm1149_vm2, %v4871_v11  ;;  %v4883_v28 = vld [vmem:[%s4656_s20 + $0x2c] sm:$0xf]  ;;  %v2370_v29 = vor.u32 %v2369_v3, %v4866_v0  ;;  %v2380_v30 = vor.u32 %v2379_v6, %v2375_v5  ;;  %vm2147_vm10 = vcmp.ne.s16.totalorder %v1875_v17, 0  ;;  %v1296_v34 = vsel %vm4629_vm1, %v4719_v36, 0 }
  0x2c   : > { %1160 = vst.msk [vmem:[#allocation2 + $0x60] sm:$0xf] %vm1149_vm2, %v4880_v9  ;;  %1161 = vst.msk [vmem:[#allocation2 + $0x68] sm:$0xf] %vm1149_vm2, %v4883_v28  ;;  %v4894_v37 = vld [vmem:[%s4656_s20 + $0x70] sm:$0xf]  ;;  %v1471_v48 = vsel %vm4750_vm12, %v1463_v39, %v1470_v23 }
  0x2d   : > { %v4897_v38 = vld [vmem:[%s4656_s20 + $0x74] sm:$0xf]  ;;  %v2179_v44 = vsel %vm2147_vm10, %v4688_v27, 0  ;;  %v2015_v50 = vrot.slane %v2013_v24, 7  ;;  %v1472_v32 = vrot.slane %v4858_v58, 4  ;;  %v2371_v54 = vrot.slane %v2370_v29, 4  ;;  %1632 = vrot.lane.b32.xlu0 %v1471_v48, %s4595_s21 }
  0x2e   : > { %1178 = vst.msk [vmem:[#allocation2 + $0xf0] sm:$0xf] %vm1149_vm2, %v4894_v37  ;;  %1179 = vst.msk [vmem:[#allocation2 + $0xf8] sm:$0xf] %vm1149_vm2, %v4897_v38  ;;  %v4908_v53 = vld [vmem:[%s4656_s20 + $0x30] sm:$0xf] }
  0x2f   : > { %v2381_v55 = vrot.slane %v2380_v30, 4  ;;  %v2223_v56 = vshll.u32 %v2179_v44, 16  ;;  %v2227_v22 = vshrl.u32 %v2179_v44, 16  ;;  %1162 = vst.msk [vmem:[#allocation2 + $0x70] sm:$0xf] %vm1149_vm2, %v4908_v53  ;;  %v2018_v39 = vor.u32 %v2016_v25, %v2015_v50 }
  0x30   : > { %v1474_v58 = vshrl.u32 %v1296_v34, 16  ;;  %v1477_v59 = vshll.u32 %v1296_v34, 16  ;;  %v2020_v60 = vrot.slane %v2015_v50, 4  ;;  %v2376_v3 = vsel %vm4915_vm11, %v2371_v54, %v2375_v5  ;;  %v4937_v54 = vld [vmem:[%s4656_s20 + $0x34] sm:$0xf] }
  0x31   : > { %v2225_v6 = vrot.slane %v2223_v56, 5  ;;  %v2229_v17 = vrot.slane %v2227_v22, 4  ;;  %v390_v23 = vand.u32 15, %v4649_v10  ;;  %2579 = vst.msk [vmem:[#allocation2 + $0x8c] sm:$0xf] %vm1149_vm2, %v2376_v3  ;;  %v2019_v24 = vsel %vm4750_vm12, %v4678_v21, %v2018_v39 }
  0x32   : > { %v1476_v29 = vrot.slane %v1474_v58, 7  ;;  %v2028_v25 = vsel %vm4750_vm12, %v2020_v60, %v4676_v20  ;;  %v688_v30 = vadd.s32 1, %v4649_v10  ;;  %vm2163_vm13 = vcmp.ne.s16.totalorder %v2019_v24, 0  ;;  %1163 = vst.msk [vmem:[#allocation2 + $0x78] sm:$0xf] %vm1149_vm2, %v4937_v54 }
  0x33   : > { %v2226_v5 = vsel %vm4915_vm11, %v4787_v8, %v2225_v6  ;;  %v2230_v34 = vor.u32 %v2229_v17, %v2225_v6  ;;  %vm2164_vm14 = vcmp.ne.s16.totalorder %v2028_v25, 0  ;;  %v2195_v44 = vsel %vm2163_vm13, %v4701_v31, 0  ;;  %v4948_v25 = vld [vmem:[%s4656_s20 + $0x78] sm:$0xf] }
  0x34   : > { %2564 = vst.msk [vmem:[#allocation2 + $0x14] sm:$0xf] %vm1149_vm2, %v2226_v5  ;;  %v1479_v48 = vor.u32 %v1477_v59, %v1476_v29  ;;  %v2196_v50 = vsel %vm2164_vm14, %v4719_v36, 0  ;;  %vm656_vm15 = vcmp.ne.s32.totalorder %v390_v23, 15  ;;  %v2383_v10 = vshll.u32 %v2195_v44, 16 }
  0x35   : > { %v4939_v56 = vrot.slane %v2230_v34, 4  ;;  %v2387_v22 = vshrl.u32 %v2195_v44, 16  ;;  %v2393_v39 = vshll.u32 %v2196_v50, 16  ;;  %vm1265_vm4 = vmpackc.low %vm656_vm15, %vm656_vm15  ;;  %v2397_v31 = vshrl.u32 %v2196_v50, 16  ;;  %1180 = vst.msk [vmem:[#allocation2 + $0x100] sm:$0xf] %vm1149_vm2, %v4948_v25 }
  0x36   : > { %v1480_v8 = vsel %vm4750_vm12, %v1472_v32, %v1479_v48  ;;  %v838_v58 = vand.u32 15, %v688_v30  ;;  %v1297_v36 = vsel %vm1265_vm4, %v4728_v41, 0  ;;  %v2385_v59 = vrot.slane %v2383_v10, 5 }
  0x37   : > { %v2389_v60 = vrot.slane %v2387_v22, 4  ;;  %v2395_v3 = vrot.slane %v2393_v39, 5  ;;  %1634 = vrot.lane.b32.xlu0 %v1480_v8, %s4595_s21  ;;  %v1481_v6 = vrot.slane %v1476_v29, 4  ;;  %v2399_v17 = vrot.slane %v2397_v31, 4 }
  0x38   : > { %vm1104_vm5 = vcmp.ne.s32.totalorder %v838_v58, 0  ;;  %v1483_v23 = vshrl.u32 %v1297_v36, 16  ;;  %v1486_v24 = vshll.u32 %v1297_v36, 16  ;;  %v2386_v5 = vsel %vm4915_vm11, %v2381_v55, %v2385_v59 }
  0x39   : > { %v2390_v32 = vor.u32 %v2389_v60, %v2385_v59  ;;  %vm1815_vm6 = vmpackc.low %vm1104_vm5, %vm1104_vm5  ;;  %v1280_v30 = vsel %vm4629_vm1, %v4736_v46, 0  ;;  %v1328_v34 = vrot.slane %v4791_v16, 4  ;;  %2580 = vst.msk [vmem:[#allocation2 + $0x94] sm:$0xf] %vm1149_vm2, %v2386_v5  ;;  %v2400_v29 = vor.u32 %v2399_v17, %v2395_v3 }
  0x3a   : > { %v4959_v44 = vrot.slane %v1483_v23, 7  ;;  %v1847_v48 = vsel %vm1815_vm6, 65537, %v4594_v2  ;;  %v1330_v50 = vshrl.u32 %v1280_v30, 16  ;;  %v1333_v39 = vshll.u32 %v1280_v30, 16 }
  0x3b   : > { %v2391_v55 = vrot.slane %v2390_v32, 4  ;;  %v2031_v10 = vshrl.u32 %v1847_v48, 16  ;;  %v2034_v22 = vshll.u32 %v1847_v48, 16  ;;  %v2401_v8 = vrot.slane %v2400_v29, 4 }
  0x3c   : > { %v1488_v31 = vor.u32 %v1486_v24, %v4959_v44  ;;  %v1332_v58 = vrot.slane %v1330_v50, 7  ;;  %v1876_v16 = vrot.slane %v4835_v45, 4  ;;  %v278_v60 = vand.u32 15, %v4659_v12 }
  0x3d   : > { %v2396_v36 = vsel %vm4915_vm11, %v2391_v55, %v2395_v3  ;;  %v2033_v59 = vrot.slane %v2031_v10, 7  ;;  %v672_v17 = vadd.s32 1, %v4659_v12  ;;  %v1490_v29 = vrot.slane %v4959_v44, 4 }
  0x3e   : > { %2581 = vst.msk [vmem:[#allocation2 + $0x9c] sm:$0xf] %vm1149_vm2, %v2396_v36  ;;  %v1489_v23 = vsel %vm4750_vm12, %v1481_v6, %v1488_v31  ;;  %v1335_v5 = vor.u32 %v1333_v39, %v1332_v58  ;;  %v1884_v24 = vsel %vm4750_vm12, %v1876_v16, %v4676_v20  ;;  %v1337_v32 = vrot.slane %v1332_v58, 4  ;;  %v4989_v58 = vld [vmem:[%s4656_s20 + $0x7c] sm:$0xf] }
  0x3f   : > { %v2036_v45 = vor.u32 %v2034_v22, %v2033_v59  ;;  %1636 = vrot.lane.b32.xlu1 %v1489_v23, %s4595_s21  ;;  %vm2148_vm7 = vcmp.ne.s16.totalorder %v1884_v24, 0  ;;  %vm640_vm8 = vcmp.ne.s32.totalorder %v278_v60, 15  ;;  %v726_v3 = vand.u32 15, %v672_v17  ;;  %1181 = vst.msk [vmem:[#allocation2 + $0x108] sm:$0xf] %vm1149_vm2, %v4989_v58 }
  0x40   : > { %v1336_v12 = vsel %vm4750_vm12, %v1328_v34, %v1335_v5  ;;  %v2180_v30 = vsel %vm2148_vm7, %v4736_v46, 0  ;;  %vm1249_vm9 = vmpackc.low %vm640_vm8, %vm640_vm8  ;;  %v1298_v6 = vsel %vm4629_vm1, %v4763_v57, 0 }
  0x41   : > { %v2037_v48 = vsel %vm4750_vm12, %v4678_v21, %v2036_v45  ;;  %v2233_v50 = vshll.u32 %v2180_v30, 16  ;;  %v2237_v55 = vshrl.u32 %v2180_v30, 16  ;;  %1602 = vrot.lane.b32.xlu0 %v1336_v12, %s4595_s21  ;;  %vm1088_vm10 = vcmp.ne.s32.totalorder %v726_v3, 0 }
  0x42   : > { %vm2165_vm13 = vcmp.ne.s16.totalorder %v2037_v48, 0  ;;  %v1281_v46 = vsel %vm1249_vm9, %v4745_v51, 0  ;;  %vm1799_vm14 = vmpackc.low %vm1088_vm10, %vm1088_vm10  ;;  %v1492_v34 = vshrl.u32 %v1298_v6, 16  ;;  %v1495_v10 = vshll.u32 %v1298_v6, 16 }
  0x43   : > { %v2197_v22 = vsel %vm2165_vm13, %v4728_v41, 0  ;;  %v2235_v39 = vrot.slane %v2233_v50, 5  ;;  %v2239_v31 = vrot.slane %v2237_v55, 4  ;;  %v1339_v44 = vshrl.u32 %v1281_v46, 16 }
  0x44   : > { %v2403_v16 = vshll.u32 %v2197_v22, 16  ;;  %v2407_v36 = vshrl.u32 %v2197_v22, 16  ;;  %v1342_v60 = vshll.u32 %v1281_v46, 16  ;;  %v1831_v17 = vsel %vm1799_vm14, 65537, %v4594_v2 }
  0x45   : > { %v2236_v23 = vsel %vm4915_vm11, %v4939_v56, %v2235_v39  ;;  %v2240_v5 = vor.u32 %v2239_v31, %v2235_v39  ;;  %v4997_v41 = vrot.slane %v1339_v44, 7  ;;  %v1887_v24 = vshrl.u32 %v1831_v17, 16  ;;  %v5007_v31 = vld [vmem:[%s4656_s20 + $0x38] sm:$0xf] }
  0x46   : > { %v2405_v45 = vrot.slane %v2403_v16, 5  ;;  %v2409_v3 = vrot.slane %v2407_v36, 4  ;;  %2565 = vst.msk [vmem:[#allocation2 + $0x1c] sm:$0xf] %vm1149_vm2, %v2236_v23  ;;  %v1890_v12 = vshll.u32 %v1831_v17, 16  ;;  %v1494_v30 = vrot.slane %v1492_v34, 7 }
  0x47   : > { %v2241_v6 = vrot.slane %v2240_v5, 4  ;;  %v1344_v48 = vor.u32 %v1342_v60, %v4997_v41  ;;  %v5001_v50 = vrot.slane %v1887_v24, 7  ;;  %v2038_v55 = vrot.slane %v2033_v59, 4  ;;  %1164 = vst.msk [vmem:[#allocation2 + $0x80] sm:$0xf] %vm1149_vm2, %v5007_v31 }
  0x48   : > { %v2406_v56 = vsel %vm4915_vm11, %v2401_v8, %v2405_v45  ;;  %v2410_v46 = vor.u32 %v2409_v3, %v2405_v45  ;;  %v1497_v22 = vor.u32 %v1495_v10, %v1494_v30  ;;  %v404_v39 = vand.u32 15, %v4662_v13 }
  0x49   : > { %2582 = vst.msk [vmem:[#allocation2 + $0xa4] sm:$0xf] %vm1149_vm2, %v2406_v56  ;;  %v1345_v34 = vsel %vm4750_vm12, %v1337_v32, %v1344_v48  ;;  %v1892_v44 = vor.u32 %v1890_v12, %v5001_v50  ;;  %v2046_v59 = vsel %vm4750_vm12, %v2038_v55, %v4676_v20  ;;  %v690_v16 = vadd.s32 1, %v4662_v13 }
  0x4a   : > { %v2411_v8 = vrot.slane %v2410_v46, 4  ;;  %1604 = vrot.lane.b32.xlu1 %v1345_v34, %s4595_s21  ;;  %v1498_v10 = vsel %vm4750_vm12, %v1490_v29, %v1497_v22  ;;  %vm2166_vm15 = vcmp.ne.s16.totalorder %v2046_v59, 0  ;;  %vm658_vm4 = vcmp.ne.s32.totalorder %v404_v39, 15 }
  0x4b   : > { %v1893_v32 = vsel %vm4750_vm12, %v4678_v21, %v1892_v44  ;;  %v2198_v36 = vsel %vm2166_vm15, %v4763_v57, 0  ;;  %1638 = vrot.lane.b32.xlu0 %v1498_v10, %s4595_s21  ;;  %v852_v13 = vand.u32 15, %v690_v16  ;;  %vm1267_vm5 = vmpackc.low %vm658_vm4, %vm658_vm4  ;;  %v1499_v60 = vrot.slane %v1494_v30, 4 }
  0x4c   : > { %vm2149_vm6 = vcmp.ne.s16.totalorder %v1893_v32, 0  ;;  %v2413_v17 = vshll.u32 %v2198_v36, 16  ;;  %v2417_v23 = vshrl.u32 %v2198_v36, 16  ;;  %v1299_v5 = vsel %vm1267_vm5, %v4770_v62, 0 }
  0x4d   : > { %v2181_v29 = vsel %vm2149_vm6, %v4745_v51, 0  ;;  %vm1106_vm7 = vcmp.ne.s32.totalorder %v852_v13, 0  ;;  %v1501_v24 = vshrl.u32 %v1299_v5, 16  ;;  %v1504_v45 = vshll.u32 %v1299_v5, 16 }
  0x4e   : > { %v2243_v3 = vshll.u32 %v2181_v29, 16  ;;  %v2247_v12 = vshrl.u32 %v2181_v29, 16  ;;  %v2415_v48 = vrot.slane %v2413_v17, 5  ;;  %v2419_v55 = vrot.slane %v2417_v23, 4  ;;  %vm1817_vm8 = vmpackc.low %vm1106_vm7, %vm1106_vm7 }
  0x4f   : > { %v5029_v57 = vrot.slane %v1501_v24, 7  ;;  %v1849_v56 = vsel %vm1817_vm8, 65537, %v4594_v2  ;;  %v1282_v30 = vsel %vm4629_vm1, %v4773_v63, 0  ;;  %v1346_v46 = vrot.slane %v4997_v41, 4 }
  0x50   : > { %v2245_v22 = vrot.slane %v2243_v3, 5  ;;  %v2249_v51 = vrot.slane %v2247_v12, 4  ;;  %v2416_v39 = vsel %vm4915_vm11, %v2411_v8, %v2415_v48  ;;  %v2420_v34 = vor.u32 %v2419_v55, %v2415_v48 }
  0x51   : > { %2583 = vst.msk [vmem:[#allocation2 + $0xac] sm:$0xf] %vm1149_vm2, %v2416_v39  ;;  %v1506_v44 = vor.u32 %v1504_v45, %v5029_v57  ;;  %v2049_v59 = vshrl.u32 %v1849_v56, 16  ;;  %v2052_v16 = vshll.u32 %v1849_v56, 16  ;;  %v1348_v10 = vshrl.u32 %v1282_v30, 16 }
  0x52   : > { %v2246_v32 = vsel %vm4915_vm11, %v2241_v6, %v2245_v22  ;;  %v2250_v36 = vor.u32 %v2249_v51, %v2245_v22  ;;  %v5042_v13 = vrot.slane %v2420_v34, 4  ;;  %v1351_v41 = vshll.u32 %v1282_v30, 16 }
  0x53   : > { %2566 = vst.msk [vmem:[#allocation2 + $0x24] sm:$0xf] %vm1149_vm2, %v2246_v32  ;;  %v1507_v8 = vsel %vm4750_vm12, %v1499_v60, %v1506_v44  ;;  %v5047_v17 = vrot.slane %v2049_v59, 7  ;;  %v5049_v23 = vrot.slane %v1348_v10, 7  ;;  %v1894_v5 = vrot.slane %v5001_v50, 4 }
  0x54   : > { %v2251_v29 = vrot.slane %v2250_v36, 4  ;;  %1640 = vrot.lane.b32.xlu1 %v1507_v8, %s4595_s21  ;;  %v292_v6 = vand.u32 15, %v4665_v14  ;;  %v674_v24 = vadd.s32 1, %v4665_v14  ;;  %v1300_v45 = vsel %vm4629_vm1, %v4800_v19, 0 }
  0x55   : > { %v2054_v3 = vor.u32 %v2052_v16, %v5047_v17  ;;  %v1353_v60 = vor.u32 %v1351_v41, %v5049_v23  ;;  %v1902_v12 = vsel %vm4750_vm12, %v1894_v5, %v4676_v20  ;;  %v1355_v50 = vrot.slane %v5049_v23, 4  ;;  %v4506_v5 = vld [vmem:[%s6118_s1 + $0x90] sm:$0xff]  }
  0x56   : > { %vm2150_vm9 = vcmp.ne.s16.totalorder %v1902_v12, 0  ;;  %vm642_vm10 = vcmp.ne.s32.totalorder %v292_v6, 15  ;;  %v740_v48 = vand.u32 15, %v674_v24  ;;  %v1508_v55 = vrot.slane %v5029_v57, 4 }
  0x57   : > { %v2055_v14 = vsel %vm4750_vm12, %v4678_v21, %v2054_v3  ;;  %v1354_v56 = vsel %vm4750_vm12, %v1346_v46, %v1353_v60  ;;  %v2182_v30 = vsel %vm2150_vm9, %v4773_v63, 0  ;;  %vm1251_vm13 = vmpackc.low %vm642_vm10, %vm642_vm10  ;;  %v1510_v22 = vshrl.u32 %v1300_v45, 16  ;;  %v4505_v63 = vld [vmem:[%s6118_s1 + $0x98] sm:$0xff]  }
  0x58   : > { %vm2167_vm14 = vcmp.ne.s16.totalorder %v2055_v14, 0  ;;  %v2253_v51 = vshll.u32 %v2182_v30, 16  ;;  %v2257_v39 = vshrl.u32 %v2182_v30, 16  ;;  %1606 = vrot.lane.b32.xlu0 %v1354_v56, %s4595_s21  ;;  %vm1090_vm15 = vcmp.ne.s32.totalorder %v740_v48, 0  ;;  %2949 = vmatpush1.bf16.msra.mxu0 %v4505_v63 }
  0x59   : > { %v2199_v34 = vsel %vm2167_vm14, %v4770_v62, 0  ;;  %v1283_v57 = vsel %vm1251_vm13, %v4785_v7, 0  ;;  %vm1801_vm4 = vmpackc.low %vm1090_vm15, %vm1090_vm15  ;;  %v5074_v44 = vrot.slane %v1510_v22, 7  ;;  %v1513_v59 = vshll.u32 %v1300_v45, 16  ;;  %4482 = vmatpush1.bf16.msra.mxu1 %v4505_v63  ;;  %2950 = vmatprep.subr.bf16.mxu0 %v4594_v2 }
  0x5a   : > { %v2423_v46 = vshll.u32 %v2199_v34, 16  ;;  %v2427_v16 = vshrl.u32 %v2199_v34, 16  ;;  %v2255_v10 = vrot.slane %v2253_v51, 5  ;;  %v2259_v32 = vrot.slane %v2257_v39, 4  ;;  %4471 = vmatprep.subr.bf16.mxu1 %v4594_v2 }
  0x5b   : > { %v1357_v36 = vshrl.u32 %v1283_v57, 16  ;;  %v1360_v41 = vshll.u32 %v1283_v57, 16  ;;  %v1833_v8 = vsel %vm1801_vm4, 65537, %v4594_v2  ;;  %v1515_v62 = vor.u32 %v1513_v59, %v5074_v44 }
  0x5c   : > { %v2425_v6 = vrot.slane %v2423_v46, 5  ;;  %v2429_v24 = vrot.slane %v2427_v16, 4  ;;  %v2256_v45 = vsel %vm4915_vm11, %v2251_v29, %v2255_v10  ;;  %v2260_v3 = vor.u32 %v2259_v32, %v2255_v10  ;;  %2951 = vmatpush1.bf16.msra.mxu0 %v4506_v5 }
  0x5d   : > { %2567 = vst.msk [vmem:[#allocation2 + $0x2c] sm:$0xf] %vm1149_vm2, %v2256_v45  ;;  %v5089_v60 = vrot.slane %v1357_v36, 7  ;;  %v1905_v12 = vshrl.u32 %v1833_v8, 16  ;;  %v1908_v48 = vshll.u32 %v1833_v8, 16  ;;  %v1516_v14 = vsel %vm4750_vm12, %v1508_v55, %v1515_v62  ;;  %4483 = vmatpush1.bf16.msra.mxu1 %v4506_v5  ;;  %2952 = vmatprep.subr.bf16.mxu0 %v4594_v2 }
  0x5e   : > { %v2426_v56 = vsel %vm4915_vm11, %v5042_v13, %v2425_v6  ;;  %v2430_v30 = vor.u32 %v2429_v24, %v2425_v6  ;;  %v5096_v29 = vrot.slane %v2260_v3, 4  ;;  %v2056_v22 = vrot.slane %v5047_v17, 4  ;;  %1642 = vrot.lane.b32.xlu0 %v1516_v14, %s4595_s21  ;;  %v4507_v13 = vld [vmem:[%s6118_s1 + $0x88] sm:$0xff]   ;;  %4472 = vmatprep.subr.bf16.mxu1 %v4594_v2 }
  0x5f   : > { %2584 = vst.msk [vmem:[#allocation2 + $0xb4] sm:$0xf] %vm1149_vm2, %v2426_v56  ;;  %v1362_v51 = vor.u32 %v1360_v41, %v5089_v60  ;;  %v5102_v39 = vrot.slane %v1905_v12, 7  ;;  %v244_v34 = vadd.s32 184, %v4640_v4  ;;  %v1517_v55 = vrot.slane %v5074_v44, 4 }
  0x60   : > { %v2431_v57 = vrot.slane %v2430_v30, 4  ;;  %v2064_v17 = vsel %vm4750_vm12, %v2056_v22, %v4676_v20  ;;  %v1284_v59 = vsel %vm4629_vm1, %v4813_v33, 0  ;;  %v1364_v63 = vrot.slane %v5089_v60, 4  ;;  %2953 = vmatpush1.bf16.msra.mxu0 %v4507_v13 }
  0x61   : > { %v1363_v46 = vsel %vm4750_vm12, %v1355_v50, %v1362_v51  ;;  %v1910_v16 = vor.u32 %v1908_v48, %v5102_v39  ;;  %vm2168_vm5 = vcmp.ne.s16.totalorder %v2064_v17, 0  ;;  %v418_v10 = vand.u32 15, %v244_v34  ;;  %4484 = vmatpush1.bf16.msra.mxu1 %v4507_v13  ;;  %v4508_v50 = vld [vmem:[%s6118_s1 + $0x80] sm:$0xff]   ;;  %2954 = vmatprep.subr.bf16.mxu0 %v4594_v2 }
  0x62   : > { %1608 = vrot.lane.b32.xlu1 %v1363_v46, %s4595_s21  ;;  %v2200_v32 = vsel %vm2168_vm5, %v4800_v19, 0  ;;  %v692_v36 = vadd.s32 1, %v244_v34  ;;  %v1366_v41 = vshrl.u32 %v1284_v59, 16  ;;  %v1369_v8 = vshll.u32 %v1284_v59, 16  ;;  %4473 = vmatprep.subr.bf16.mxu1 %v4594_v2 }
  0x63   : > { %v1911_v62 = vsel %vm4750_vm12, %v4678_v21, %v1910_v16  ;;  %v2433_v5 = vshll.u32 %v2200_v32, 16  ;;  %v2437_v23 = vshrl.u32 %v2200_v32, 16  ;;  %vm660_vm6 = vcmp.ne.s32.totalorder %v418_v10, 15  ;;  %v4510_v32 = vld [vmem:[%s6118_s1 + $0x70] sm:$0xff]  }
  0x64   : > { %vm2151_vm7 = vcmp.ne.s16.totalorder %v1911_v62, 0  ;;  %v866_v6 = vand.u32 15, %v692_v36  ;;  %vm1269_vm8 = vmpackc.low %vm660_vm6, %vm660_vm6  ;;  %v5131_v19 = vrot.slane %v1366_v41, 7  ;;  %v1912_v24 = vrot.slane %v5102_v39, 4  ;;  %2955 = vmatpush1.bf16.msra.mxu0 %v4508_v50 }
  0x65   : > { %v2183_v45 = vsel %vm2151_vm7, %v4785_v7, 0  ;;  %v2435_v3 = vrot.slane %v2433_v5, 5  ;;  %v2439_v60 = vrot.slane %v2437_v23, 4  ;;  %v1301_v12 = vsel %vm1269_vm8, %v4807_v26, 0  ;;  %4485 = vmatpush1.bf16.msra.mxu1 %v4508_v50  ;;  %v4509_v7 = vld [vmem:[%s6118_s1 + $0x78] sm:$0xff]   ;;  %2956 = vmatprep.subr.bf16.mxu0 %v4594_v2 }
  0x66   : > { %v2263_v48 = vshll.u32 %v2183_v45, 16  ;;  %v2267_v14 = vshrl.u32 %v2183_v45, 16  ;;  %vm1108_vm9 = vcmp.ne.s32.totalorder %v866_v6, 0  ;;  %v1519_v56 = vshrl.u32 %v1301_v12, 16  ;;  %4474 = vmatprep.subr.bf16.mxu1 %v4594_v2 }
  0x67   : > { %v2436_v30 = vsel %vm4915_vm11, %v2431_v57, %v2435_v3  ;;  %v2440_v22 = vor.u32 %v2439_v60, %v2435_v3  ;;  %v1522_v51 = vshll.u32 %v1301_v12, 16  ;;  %vm1819_vm10 = vmpackc.low %vm1108_vm9, %vm1108_vm9  ;;  %v1371_v39 = vor.u32 %v1369_v8, %v5131_v19 }
  0x68   : > { %v2265_v34 = vrot.slane %v2263_v48, 5  ;;  %v2269_v13 = vrot.slane %v2267_v14, 4  ;;  %2585 = vst.msk [vmem:[#allocation2 + $0xbc] sm:$0xf] %vm1149_vm2, %v2436_v30  ;;  %v5145_v17 = vrot.slane %v1519_v56, 7  ;;  %v1851_v59 = vsel %vm1819_vm10, 65537, %v4594_v2  ;;  %2957 = vmatpush1.bf16.msra.mxu0 %v4509_v7 }
  0x69   : > { %v5150_v57 = vrot.slane %v2440_v22, 4  ;;  %v2067_v46 = vshrl.u32 %v1851_v59, 16  ;;  %v2070_v16 = vshll.u32 %v1851_v59, 16  ;;  %v1372_v10 = vsel %vm4750_vm12, %v1364_v63, %v1371_v39  ;;  %4486 = vmatpush1.bf16.msra.mxu1 %v4509_v7  ;;  %2958 = vmatprep.subr.bf16.mxu0 %v4594_v2  ;;  %v4511_v22 = vld [vmem:[%s6118_s1 + $0x68] sm:$0xff]  }
  0x6a   : > { %v2266_v36 = vsel %vm4915_vm11, %v5096_v29, %v2265_v34  ;;  %v2270_v41 = vor.u32 %v2269_v13, %v2265_v34  ;;  %v1524_v8 = vor.u32 %v1522_v51, %v5145_v17  ;;  %v1920_v62 = vsel %vm4750_vm12, %v1912_v24, %v4676_v20  ;;  %1610 = vrot.lane.b32.xlu0 %v1372_v10, %s4595_s21 }
  0x6b   : > { %2568 = vst.msk [vmem:[#allocation2 + $0x34] sm:$0xf] %vm1149_vm2, %v2266_v36  ;;  %v2069_v63 = vrot.slane %v2067_v46, 7  ;;  %vm2152_vm13 = vcmp.ne.s16.totalorder %v1920_v62, 0  ;;  %v228_v5 = vadd.s32 56, %v4640_v4  ;;  %v1373_v23 = vrot.slane %v5131_v19, 4  ;;  %4475 = vmatprep.subr.bf16.mxu1 %v4594_v2 }
  0x6c   : > { %v2271_v29 = vrot.slane %v2270_v41, 4  ;;  %v1525_v50 = vsel %vm4750_vm12, %v1517_v55, %v1524_v8  ;;  %v2184_v6 = vsel %vm2152_vm13, %v4813_v33, 0  ;;  %v1302_v24 = vsel %vm4629_vm1, %v4829_v42, 0  ;;  %2959 = vmatpush1.bf16.msra.mxu0 %v4510_v32  ;;  %v4512_v8 = vld [vmem:[%s6118_s1 + $0x60] sm:$0xff]  }
  0x6d   : > { %v2072_v45 = vor.u32 %v2070_v16, %v2069_v63  ;;  %1644 = vrot.lane.b32.xlu1 %v1525_v50, %s4595_s21  ;;  %v2273_v3 = vshll.u32 %v2184_v6, 16  ;;  %v2277_v60 = vshrl.u32 %v2184_v6, 16  ;;  %v306_v12 = vand.u32 15, %v228_v5  ;;  %4487 = vmatpush1.bf16.msra.mxu1 %v4510_v32 }
  0x6e   : > { %v676_v44 = vadd.s32 1, %v228_v5  ;;  %v1526_v48 = vrot.slane %v5145_v17, 4  ;;  %v1528_v55 = vshrl.u32 %v1302_v24, 16  ;;  %v1531_v14 = vshll.u32 %v1302_v24, 16  ;;  %2960 = vmatprep.subr.bf16.mxu0 %v4594_v2  ;;  %4476 = vmatprep.subr.bf16.mxu1 %v4594_v2 }
  0x6f   : > { %v2073_v33 = vsel %vm4750_vm12, %v4678_v21, %v2072_v45  ;;  %v2275_v56 = vrot.slane %v2273_v3, 5  ;;  %v2279_v30 = vrot.slane %v2277_v60, 4  ;;  %vm644_vm14 = vcmp.ne.s32.totalorder %v306_v12, 15 }
  0x70   : > { %vm2169_vm15 = vcmp.ne.s16.totalorder %v2073_v33, 0  ;;  %v754_v51 = vand.u32 15, %v676_v44  ;;  %vm1253_vm4 = vmpackc.low %vm644_vm14, %vm644_vm14  ;;  %v5186_v39 = vrot.slane %v1528_v55, 7  ;;  %v2074_v7 = vrot.slane %v2069_v63, 4  ;;  %2961 = vmatpush1.bf16.msra.mxu0 %v4511_v22 }
  0x71   : > { %v2201_v34 = vsel %vm2169_vm15, %v4807_v26, 0  ;;  %v2276_v13 = vsel %vm4915_vm11, %v2271_v29, %v2275_v56  ;;  %v2280_v17 = vor.u32 %v2279_v30, %v2275_v56  ;;  %v1285_v59 = vsel %vm1253_vm4, %v4826_v40, 0  ;;  %4488 = vmatpush1.bf16.msra.mxu1 %v4511_v22  ;;  %2962 = vmatprep.subr.bf16.mxu0 %v4594_v2 }
  0x72   : > { %v2443_v46 = vshll.u32 %v2201_v34, 16  ;;  %v2447_v16 = vshrl.u32 %v2201_v34, 16  ;;  %2569 = vst.msk [vmem:[#allocation2 + $0x3c] sm:$0xf] %vm1149_vm2, %v2276_v13  ;;  %vm1092_vm5 = vcmp.ne.s32.totalorder %v754_v51, 0  ;;  %v1375_v10 = vshrl.u32 %v1285_v59, 16  ;;  %4477 = vmatprep.subr.bf16.mxu1 %v4594_v2 }
  0x73   : > { %v5195_v32 = vrot.slane %v2280_v17, 4  ;;  %v1378_v36 = vshll.u32 %v1285_v59, 16  ;;  %vm1803_vm6 = vmpackc.low %vm1092_vm5, %vm1092_vm5  ;;  %v1533_v41 = vor.u32 %v1531_v14, %v5186_v39  ;;  %v2082_v26 = vsel %vm4750_vm12, %v2074_v7, %v4676_v20 }
  0x74   : > { %v2445_v62 = vrot.slane %v2443_v46, 5  ;;  %v2449_v63 = vrot.slane %v2447_v16, 4  ;;  %v5204_v5 = vrot.slane %v1375_v10, 7  ;;  %v1835_v29 = vsel %vm1803_vm6, 65537, %v4594_v2  ;;  %2963 = vmatpush1.bf16.msra.mxu0 %v4512_v8  ;;  %v4514_v10 = vld [vmem:[%s6118_s1 + $0xb0] sm:$0xff]  }
  0x75   : > { %v1923_v50 = vshrl.u32 %v1835_v29, 16  ;;  %v1926_v6 = vshll.u32 %v1835_v29, 16  ;;  %v1534_v24 = vsel %vm4750_vm12, %v1526_v48, %v1533_v41  ;;  %vm2170_vm7 = vcmp.ne.s16.totalorder %v2082_v26, 0  ;;  %4489 = vmatpush1.bf16.msra.mxu1 %v4512_v8  ;;  %2972 = vmatprep.subr.bf16.mxu0 %v4594_v2 }
  0x76   : > { %v2446_v45 = vsel %vm4915_vm11, %v5150_v57, %v2445_v62  ;;  %v2450_v3 = vor.u32 %v2449_v63, %v2445_v62  ;;  %v1380_v60 = vor.u32 %v1378_v36, %v5204_v5  ;;  %v2202_v12 = vsel %vm2170_vm7, %v4829_v42, 0  ;;  %1646 = vrot.lane.b32.xlu0 %v1534_v24, %s4595_s21  ;;  %v4513_v57 = vld [vmem:[%s6118_s1 + $0xb8] sm:$0xff]   ;;  %4478 = vmatprep.subr.bf16.mxu1 %v4594_v2 }
  0x77   : > { %2586 = vst.msk [vmem:[#allocation2 + $0xc4] sm:$0xf] %vm1149_vm2, %v2446_v45  ;;  %v1925_v44 = vrot.slane %v1923_v50, 7  ;;  %v2453_v55 = vshll.u32 %v2202_v12, 16  ;;  %v2457_v14 = vshrl.u32 %v2202_v12, 16  ;;  %v246_v33 = vadd.s32 200, %v4640_v4 }
  0x78   : > { %v2451_v48 = vrot.slane %v2450_v3, 4  ;;  %v1381_v42 = vsel %vm4750_vm12, %v1373_v23, %v1380_v60  ;;  %v1535_v56 = vrot.slane %v5186_v39, 4  ;;  %v1286_v30 = vsel %vm4629_vm1, %v4850_v43, 0  ;;  %2973 = vmatpush2.bf16.msra.mxu0 %v4513_v57 }
  0x79   : > { %v1928_v22 = vor.u32 %v1926_v6, %v1925_v44  ;;  %1612 = vrot.lane.b32.xlu1 %v1381_v42, %s4595_s21  ;;  %v2455_v51 = vrot.slane %v2453_v55, 5  ;;  %v2459_v7 = vrot.slane %v2457_v14, 4  ;;  %v432_v34 = vand.u32 15, %v246_v33  ;;  %4490 = vmatpush2.bf16.msra.mxu1 %v4513_v57 }
  0x7a   : > { %v694_v19 = vadd.s32 1, %v246_v33  ;;  %v1382_v13 = vrot.slane %v5204_v5, 4  ;;  %v1384_v23 = vshrl.u32 %v1286_v30, 16  ;;  %v1387_v17 = vshll.u32 %v1286_v30, 16  ;;  %2974 = vmatprep.subr.bf16.mxu0 %v4594_v2  ;;  %4479 = vmatprep.subr.bf16.mxu1 %v4594_v2 }
  0x7b   : > { %v1929_v59 = vsel %vm4750_vm12, %v4678_v21, %v1928_v22  ;;  %v2456_v46 = vsel %vm4915_vm11, %v2451_v48, %v2455_v51  ;;  %v2460_v16 = vor.u32 %v2459_v7, %v2455_v51  ;;  %vm662_vm8 = vcmp.ne.s32.totalorder %v432_v34, 15 }
  0x7c   : > { %vm2153_vm9 = vcmp.ne.s16.totalorder %v1929_v59, 0  ;;  %2587 = vst.msk [vmem:[#allocation2 + $0xcc] sm:$0xf] %vm1149_vm2, %v2456_v46  ;;  %v880_v36 = vand.u32 15, %v694_v19  ;;  %vm1271_vm10 = vmpackc.low %vm662_vm8, %vm662_vm8  ;;  %v5243_v41 = vrot.slane %v1384_v23, 7  ;;  %v1930_v26 = vrot.slane %v1925_v44, 4  ;;  %2975 = vmatpush2.bf16.msra.mxu0 %v4514_v10 }
  0x7d   : > { %v2185_v8 = vsel %vm2153_vm9, %v4826_v40, 0  ;;  %v5248_v62 = vrot.slane %v2460_v16, 4  ;;  %v1303_v63 = vsel %vm1271_vm10, %v4842_v47, 0  ;;  %v230_v5 = vadd.s32 72, %v4640_v4  ;;  %4491 = vmatpush2.bf16.msra.mxu1 %v4514_v10  ;;  %v4515_v40 = vld [vmem:[%s6118_s1 + $0xa8] sm:$0xff]   ;;  %2976 = vmatprep.subr.bf16.mxu0 %v4594_v2 }
  0x7e   : > { %v2283_v29 = vshll.u32 %v2185_v8, 16  ;;  %v2287_v50 = vshrl.u32 %v2185_v8, 16  ;;  %vm1110_vm13 = vcmp.ne.s32.totalorder %v880_v36, 0  ;;  %v1537_v6 = vshrl.u32 %v1303_v63, 16  ;;  %4480 = vmatprep.subr.bf16.mxu1 %v4594_v2 }
  0x7f   : > { %v1540_v24 = vshll.u32 %v1303_v63, 16  ;;  %vm1821_vm14 = vmpackc.low %vm1110_vm13, %vm1110_vm13  ;;  %v1389_v45 = vor.u32 %v1387_v17, %v5243_v41  ;;  %v1938_v3 = vsel %vm4750_vm12, %v1930_v26, %v4676_v20  ;;  %v320_v60 = vand.u32 15, %v230_v5 }
  0x80   : > { %v2285_v12 = vrot.slane %v2283_v29, 5  ;;  %v2289_v44 = vrot.slane %v2287_v50, 4  ;;  %v5259_v55 = vrot.slane %v1537_v6, 7  ;;  %v1853_v14 = vsel %vm1821_vm14, 65537, %v4594_v2  ;;  %2977 = vmatpush2.bf16.msra.mxu0 %v4515_v40 }
  0x81   : > { %v2085_v33 = vshrl.u32 %v1853_v14, 16  ;;  %v2088_v57 = vshll.u32 %v1853_v14, 16  ;;  %v1390_v48 = vsel %vm4750_vm12, %v1382_v13, %v1389_v45  ;;  %vm2154_vm15 = vcmp.ne.s16.totalorder %v1938_v3, 0  ;;  %4492 = vmatpush2.bf16.msra.mxu1 %v4515_v40  ;;  %2978 = vmatprep.subr.bf16.mxu0 %v4594_v2 }
  0x82   : > { %v2286_v42 = vsel %vm4915_vm11, %v5195_v32, %v2285_v12  ;;  %v2290_v30 = vor.u32 %v2289_v44, %v2285_v12  ;;  %v1542_v22 = vor.u32 %v1540_v24, %v5259_v55  ;;  %v2186_v51 = vsel %vm2154_vm15, %v4850_v43, 0  ;;  %1614 = vrot.lane.b32.xlu0 %v1390_v48, %s4595_s21  ;;  %v4516_v32 = vld [vmem:[%s6118_s1 + $0xa0] sm:$0xff]   ;;  %4481 = vmatprep.subr.bf16.mxu1 %v4594_v2 }
  0x83   : > { %2570 = vst.msk [vmem:[#allocation2 + $0x44] sm:$0xf] %vm1149_vm2, %v2286_v42  ;;  %v2087_v7 = vrot.slane %v2085_v33, 7  ;;  %v2293_v34 = vshll.u32 %v2186_v51, 16  ;;  %v2297_v19 = vshrl.u32 %v2186_v51, 16  ;;  %vm5273_vm4 = vcmp.ne.s32.totalorder %v320_v60, 15 }
  0x84   : > { %v2291_v13 = vrot.slane %v2290_v30, 4  ;;  %v1543_v43 = vsel %vm4750_vm12, %v1535_v56, %v1542_v22  ;;  %v678_v17 = vadd.s32 1, %v230_v5  ;;  %vm1255_vm5 = vmpackc.low %vm5273_vm4, %vm5273_vm4  ;;  %v1391_v59 = vrot.slane %v5243_v41, 4  ;;  %2979 = vmatpush2.bf16.msra.mxu0 %v4516_v32 }
  0x85   : > { %v2090_v46 = vor.u32 %v2088_v57, %v2087_v7  ;;  %1648 = vrot.lane.b32.xlu1 %v1543_v43, %s4595_s21  ;;  %v2295_v16 = vrot.slane %v2293_v34, 5  ;;  %v2299_v10 = vrot.slane %v2297_v19, 4  ;;  %v1287_v39 = vsel %vm1255_vm5, %v4855_v18, 0  ;;  %4493 = vmatpush2.bf16.msra.mxu1 %v4516_v32 }
  0x86   : > { %v768_v36 = vand.u32 15, %v678_v17  ;;  %v1393_v56 = vshrl.u32 %v1287_v39, 16  ;;  %v1396_v26 = vshll.u32 %v1287_v39, 16  ;;  %v1304_v8 = vsel %vm4629_vm1, %v4864_v61, 0  ;;  %3193 = vmatprep.subr.bf16.mxu1 %v4594_v2  ;;  %3675 = vmatprep.subr.bf16.mxu0 %v4594_v2 }
  0x87   : > { %v2091_v41 = vsel %vm4750_vm12, %v4678_v21, %v2090_v46  ;;  %v2296_v63 = vsel %vm4915_vm11, %v2291_v13, %v2295_v16  ;;  %v2300_v5 = vor.u32 %v2299_v10, %v2295_v16  ;;  %v1544_v29 = vrot.slane %v5259_v55, 4 }
  0x88   : > { %vm2171_vm6 = vcmp.ne.s16.totalorder %v2091_v41, 0  ;;  %2571 = vst.msk [vmem:[#allocation2 + $0x4c] sm:$0xf] %vm1149_vm2, %v2296_v63  ;;  %vm1094_vm7 = vcmp.ne.s32.totalorder %v768_v36, 0  ;;  %v5302_v50 = vrot.slane %v1393_v56, 7  ;;  %v1546_v6 = vshrl.u32 %v1304_v8, 16 }
  0x89   : > { %v2203_v24 = vsel %vm2171_vm6, %v4842_v47, 0  ;;  %v5307_v45 = vrot.slane %v2300_v5, 4  ;;  %vm1805_vm8 = vmpackc.low %vm1094_vm7, %vm1094_vm7  ;;  %v1549_v3 = vshll.u32 %v1304_v8, 16  ;;  %v2092_v60 = vrot.slane %v2087_v7, 4 }
  0x8a   : > { %v2463_v40 = vshll.u32 %v2203_v24, 16  ;;  %v2467_v12 = vshrl.u32 %v2203_v24, 16  ;;  %v1398_v44 = vor.u32 %v1396_v26, %v5302_v50  ;;  %v1837_v55 = vsel %vm1805_vm8, 65537, %v4594_v2 }
  0x8b   : > { %v1941_v14 = vshrl.u32 %v1837_v55, 16  ;;  %v1944_v33 = vshll.u32 %v1837_v55, 16  ;;  %v5311_v57 = vrot.slane %v1546_v6, 7  ;;  %v2100_v48 = vsel %vm4750_vm12, %v2092_v60, %v4676_v20 }
  0x8c   : > { %v2465_v47 = vrot.slane %v2463_v40, 5  ;;  %v2469_v42 = vrot.slane %v2467_v12, 4  ;;  %v1399_v30 = vsel %vm4750_vm12, %v1391_v59, %v1398_v44  ;;  %vm2172_vm9 = vcmp.ne.s16.totalorder %v2100_v48, 0 }
  0x8d   : > { %v1943_v22 = vrot.slane %v1941_v14, 7  ;;  %1616 = vrot.lane.b32.xlu1 %v1399_v30, %s4595_s21  ;;  %v1551_v51 = vor.u32 %v1549_v3, %v5311_v57  ;;  %v2204_v7 = vsel %vm2172_vm9, %v4864_v61, 0  ;;  %v248_v34 = vadd.s32 216, %v4640_v4 }
  0x8e   : > { %v2466_v19 = vsel %vm4915_vm11, %v5248_v62, %v2465_v47  ;;  %v2470_v23 = vor.u32 %v2469_v42, %v2465_v47  ;;  %v2473_v32 = vshll.u32 %v2204_v7, 16  ;;  %v2477_v13 = vshrl.u32 %v2204_v7, 16 }
  0x8f   : > { %2588 = vst.msk [vmem:[#allocation2 + $0xd4] sm:$0xf] %vm1149_vm2, %v2466_v19  ;;  %v1946_v43 = vor.u32 %v1944_v33, %v1943_v22  ;;  %v1552_v17 = vsel %vm4750_vm12, %v1544_v29, %v1551_v51  ;;  %v446_v59 = vand.u32 15, %v248_v34  ;;  %v696_v46 = vadd.s32 1, %v248_v34 }
  0x90   : > { %v2471_v16 = vrot.slane %v2470_v23, 4  ;;  %v2475_v10 = vrot.slane %v2473_v32, 5  ;;  %v2479_v61 = vrot.slane %v2477_v13, 4  ;;  %1650 = vrot.lane.b32.xlu0 %v1552_v17, %s4595_s21  ;;  %v1553_v39 = vrot.slane %v5311_v57, 4 }
  0x91   : > { %v1947_v62 = vsel %vm4750_vm12, %v4678_v21, %v1946_v43  ;;  %vm664_vm10 = vcmp.ne.s32.totalorder %v446_v59, 15  ;;  %v894_v36 = vand.u32 15, %v696_v46  ;;  %v1288_v56 = vsel %vm4629_vm1, %v4880_v9, 0 }
  0x92   : > { %vm2155_vm13 = vcmp.ne.s16.totalorder %v1947_v62, 0  ;;  %v2476_v26 = vsel %vm4915_vm11, %v2471_v16, %v2475_v10  ;;  %v2480_v8 = vor.u32 %v2479_v61, %v2475_v10  ;;  %vm1273_vm14 = vmpackc.low %vm664_vm10, %vm664_vm10  ;;  %v1400_v41 = vrot.slane %v5302_v50, 4 }
  0x93   : > { %v2187_v63 = vsel %vm2155_vm13, %v4855_v18, 0  ;;  %2589 = vst.msk [vmem:[#allocation2 + $0xdc] sm:$0xf] %vm1149_vm2, %v2476_v26  ;;  %vm1112_vm15 = vcmp.ne.s32.totalorder %v894_v36, 0  ;;  %v1305_v5 = vsel %vm1273_vm14, %v4871_v11, 0  ;;  %v1402_v29 = vshrl.u32 %v1288_v56, 16 }
  0x94   : > { %v2303_v6 = vshll.u32 %v2187_v63, 16  ;;  %v2307_v24 = vshrl.u32 %v2187_v63, 16  ;;  %v5342_v3 = vrot.slane %v2480_v8, 4  ;;  %v1555_v60 = vshrl.u32 %v1305_v5, 16  ;;  %vm1823_vm4 = vmpackc.low %vm1112_vm15, %vm1112_vm15 }
  0x95   : > { %v1558_v40 = vshll.u32 %v1305_v5, 16  ;;  %v1855_v12 = vsel %vm1823_vm4, 65537, %v4594_v2  ;;  %v5345_v44 = vrot.slane %v1402_v29, 7  ;;  %v1405_v50 = vshll.u32 %v1288_v56, 16 }
  0x96   : > { %v2305_v55 = vrot.slane %v2303_v6, 5  ;;  %v2309_v18 = vrot.slane %v2307_v24, 4  ;;  %v5347_v14 = vrot.slane %v1555_v60, 7  ;;  %v2103_v33 = vshrl.u32 %v1855_v12, 16 }
  0x97   : > { %v2106_v57 = vshll.u32 %v1855_v12, 16  ;;  %v1407_v48 = vor.u32 %v1405_v50, %v5345_v44  ;;  %v1948_v47 = vrot.slane %v1943_v22, 4  ;;  %v232_v42 = vadd.s32 88, %v4640_v4 }
  0x98   : > { %v2306_v30 = vsel %vm4915_vm11, %v5307_v45, %v2305_v55  ;;  %v2310_v51 = vor.u32 %v2309_v18, %v2305_v55  ;;  %v1560_v7 = vor.u32 %v1558_v40, %v5347_v14  ;;  %v2105_v34 = vrot.slane %v2103_v33, 7 }
  0x99   : > { %2572 = vst.msk [vmem:[#allocation2 + $0x54] sm:$0xf] %vm1149_vm2, %v2306_v30  ;;  %v1408_v19 = vsel %vm4750_vm12, %v1400_v41, %v1407_v48  ;;  %v1956_v23 = vsel %vm4750_vm12, %v1948_v47, %v4676_v20  ;;  %v334_v22 = vand.u32 15, %v232_v42  ;;  %v680_v32 = vadd.s32 1, %v232_v42 }
  0x9a   : > { %v2311_v13 = vrot.slane %v2310_v51, 4  ;;  %v1561_v43 = vsel %vm4750_vm12, %v1553_v39, %v1560_v7  ;;  %v2108_v45 = vor.u32 %v2106_v57, %v2105_v34  ;;  %vm2156_vm5 = vcmp.ne.s16.totalorder %v1956_v23, 0  ;;  %1618 = vrot.lane.b32.xlu0 %v1408_v19, %s4595_s21 }
  0x9b   : > { %1652 = vrot.lane.b32.xlu1 %v1561_v43, %s4595_s21  ;;  %v2188_v17 = vsel %vm2156_vm5, %v4880_v9, 0  ;;  %vm648_vm6 = vcmp.ne.s32.totalorder %v334_v22, 15  ;;  %v782_v59 = vand.u32 15, %v680_v32  ;;  %v1409_v46 = vrot.slane %v5345_v44, 4 }
  0x9c   : > { %v2109_v16 = vsel %vm4750_vm12, %v4678_v21, %v2108_v45  ;;  %v2313_v10 = vshll.u32 %v2188_v17, 16  ;;  %v2317_v61 = vshrl.u32 %v2188_v17, 16  ;;  %vm1257_vm7 = vmpackc.low %vm648_vm6, %vm648_vm6  ;;  %v1306_v39 = vsel %vm4629_vm1, %v4894_v37, 0 }
  0x9d   : > { %vm2173_vm8 = vcmp.ne.s16.totalorder %v2109_v16, 0  ;;  %vm1096_vm9 = vcmp.ne.s32.totalorder %v782_v59, 0  ;;  %v1289_v62 = vsel %vm1257_vm7, %v4883_v28, 0  ;;  %v1562_v9 = vrot.slane %v5347_v14, 4 }
  0x9e   : > { %v2205_v36 = vsel %vm2173_vm8, %v4871_v11, 0  ;;  %v2315_v56 = vrot.slane %v2313_v10, 5  ;;  %v2319_v26 = vrot.slane %v2317_v61, 4  ;;  %v1411_v8 = vshrl.u32 %v1289_v62, 16  ;;  %vm1807_vm10 = vmpackc.low %vm1096_vm9, %vm1096_vm9 }
  0x9f   : > { %v2483_v41 = vshll.u32 %v2205_v36, 16  ;;  %v2487_v63 = vshrl.u32 %v2205_v36, 16  ;;  %v1414_v5 = vshll.u32 %v1289_v62, 16  ;;  %v1839_v29 = vsel %vm1807_vm10, 65537, %v4594_v2 }
  0xa0   : > { %v2316_v6 = vsel %vm4915_vm11, %v2311_v13, %v2315_v56  ;;  %v2320_v24 = vor.u32 %v2319_v26, %v2315_v56  ;;  %v5379_v60 = vrot.slane %v1411_v8, 7  ;;  %v1959_v40 = vshrl.u32 %v1839_v29, 16 }
  0xa1   : > { %v2485_v12 = vrot.slane %v2483_v41, 5  ;;  %v2489_v44 = vrot.slane %v2487_v63, 4  ;;  %2573 = vst.msk [vmem:[#allocation2 + $0x5c] sm:$0xf] %vm1149_vm2, %v2316_v6  ;;  %v1962_v11 = vshll.u32 %v1839_v29, 16  ;;  %v1564_v50 = vshrl.u32 %v1306_v39, 16 }
  0xa2   : > { %v2321_v55 = vrot.slane %v2320_v24, 4  ;;  %v1416_v18 = vor.u32 %v1414_v5, %v5379_v60  ;;  %v5383_v14 = vrot.slane %v1959_v40, 7  ;;  %v1567_v33 = vshll.u32 %v1306_v39, 16  ;;  %v5418_v24 = vpop.permute.xlu0 %1630 }
  0xa3   : > { %v2486_v57 = vsel %vm4915_vm11, %v5342_v3, %v2485_v12  ;;  %v2490_v48 = vor.u32 %v2489_v44, %v2485_v12  ;;  %v5388_v47 = vrot.slane %v1564_v50, 7  ;;  %v2110_v42 = vrot.slane %v2105_v34, 4 }
  0xa4   : > { %2590 = vst.msk [vmem:[#allocation2 + $0xe4] sm:$0xf] %vm1149_vm2, %v2486_v57  ;;  %v1417_v30 = vsel %vm4750_vm12, %v1409_v46, %v1416_v18  ;;  %v1964_v51 = vor.u32 %v1962_v11, %v5383_v14  ;;  %v250_v7 = vadd.s32 232, %v4640_v4  ;;  %v1290_v19 = vsel %vm4629_vm1, %v4908_v53, 0 }
  0xa5   : > { %v2491_v23 = vrot.slane %v2490_v48, 4  ;;  %1620 = vrot.lane.b32.xlu1 %v1417_v30, %s4595_s21  ;;  %v1569_v3 = vor.u32 %v1567_v33, %v5388_v47  ;;  %v2118_v34 = vsel %vm4750_vm12, %v2110_v42, %v4676_v20  ;;  %v1571_v22 = vrot.slane %v5388_v47, 4 }
  0xa6   : > { %v1965_v32 = vsel %vm4750_vm12, %v4678_v21, %v1964_v51  ;;  %vm2174_vm13 = vcmp.ne.s16.totalorder %v2118_v34, 0  ;;  %v460_v13 = vand.u32 15, %v250_v7  ;;  %v698_v43 = vadd.s32 1, %v250_v7 }
  0xa7   : > { %vm2157_vm14 = vcmp.ne.s16.totalorder %v1965_v32, 0  ;;  %v1570_v45 = vsel %vm4750_vm12, %v1562_v9, %v1569_v3  ;;  %v2206_v17 = vsel %vm2174_vm13, %v4894_v37, 0  ;;  %v1418_v59 = vrot.slane %v5379_v60, 4 }
  0xa8   : > { %v2189_v46 = vsel %vm2157_vm14, %v4883_v28, 0  ;;  %v2493_v16 = vshll.u32 %v2206_v17, 16  ;;  %v2497_v10 = vshrl.u32 %v2206_v17, 16  ;;  %1654 = vrot.lane.b32.xlu0 %v1570_v45, %s4595_s21  ;;  %vm666_vm15 = vcmp.ne.s32.totalorder %v460_v13, 15  ;;  %v5444_v13 = vpop.permute.xlu0 %1632  ;;  %v5447_v17 = vpop.permute.xlu1 %1598 }
  0xa9   : > { %v2323_v61 = vshll.u32 %v2189_v46, 16  ;;  %v2327_v39 = vshrl.u32 %v2189_v46, 16  ;;  %v908_v62 = vand.u32 15, %v698_v43  ;;  %vm1275_vm4 = vmpackc.low %vm666_vm15, %vm666_vm15  ;;  %v1420_v36 = vshrl.u32 %v1290_v19, 16 }
  0xaa   : > { %v2495_v56 = vrot.slane %v2493_v16, 5  ;;  %v2499_v26 = vrot.slane %v2497_v10, 4  ;;  %v1307_v9 = vsel %vm1275_vm4, %v4897_v38, 0  ;;  %v1423_v8 = vshll.u32 %v1290_v19, 16 }
  0xab   : > { %v2325_v37 = vrot.slane %v2323_v61, 5  ;;  %v2329_v41 = vrot.slane %v2327_v39, 4  ;;  %vm1114_vm5 = vcmp.ne.s32.totalorder %v908_v62, 0  ;;  %v1573_v63 = vshrl.u32 %v1307_v9, 16 }
  0xac   : > { %v2496_v28 = vsel %vm4915_vm11, %v2491_v23, %v2495_v56  ;;  %v2500_v5 = vor.u32 %v2499_v26, %v2495_v56  ;;  %v1576_v29 = vshll.u32 %v1307_v9, 16  ;;  %vm1825_vm6 = vmpackc.low %vm1114_vm5, %vm1114_vm5  ;;  %v5416_v6 = vrot.slane %v1420_v36, 7 }
  0xad   : > { %v2326_v60 = vsel %vm4915_vm11, %v2321_v55, %v2325_v37  ;;  %v2330_v40 = vor.u32 %v2329_v41, %v2325_v37  ;;  %2591 = vst.msk [vmem:[#allocation2 + $0xec] sm:$0xf] %vm1149_vm2, %v2496_v28  ;;  %v5423_v12 = vrot.slane %v1573_v63, 7  ;;  %v1857_v44 = vsel %vm1825_vm6, 65537, %v4594_v2 }
  0xae   : > { %2574 = vst.msk [vmem:[#allocation2 + $0x64] sm:$0xf] %vm1149_vm2, %v2326_v60  ;;  %v2121_v11 = vshrl.u32 %v1857_v44, 16  ;;  %v2124_v50 = vshll.u32 %v1857_v44, 16  ;;  %v1425_v18 = vor.u32 %v1423_v8, %v5416_v6  ;;  %v2501_v33 = vrot.slane %v2500_v5, 4  ;;  %v5466_v44 = vpop.permute.xlu1 %1600 }
  0xaf   : > { %v1578_v57 = vor.u32 %v1576_v29, %v5423_v12  ;;  %v1966_v48 = vrot.slane %v5383_v14, 4  ;;  %v234_v55 = vadd.s32 104, %v4640_v4  ;;  %v2331_v47 = vrot.slane %v2330_v40, 4  ;;  %v5462_v29 = vpop.permute.xlu0 %1634 }
  0xb0   : > { %v2123_v42 = vrot.slane %v2121_v11, 7  ;;  %v1426_v30 = vsel %vm4750_vm12, %v1418_v59, %v1425_v18  ;;  %v1308_v51 = vsel %vm4629_vm1, %v4948_v25, 0  ;;  %v1580_v34 = vrot.slane %v5423_v12, 4 }
  0xb1   : > { %v1579_v7 = vsel %vm4750_vm12, %v1571_v22, %v1578_v57  ;;  %v1974_v19 = vsel %vm4750_vm12, %v1966_v48, %v4676_v20  ;;  %1622 = vrot.lane.b32.xlu0 %v1426_v30, %s4595_s21  ;;  %v348_v14 = vand.u32 15, %v234_v55  ;;  %v682_v23 = vadd.s32 1, %v234_v55 }
  0xb2   : > { %v2126_v3 = vor.u32 %v2124_v50, %v2123_v42  ;;  %1656 = vrot.lane.b32.xlu1 %v1579_v7, %s4595_s21  ;;  %vm2158_vm7 = vcmp.ne.s16.totalorder %v1974_v19, 0  ;;  %v1582_v32 = vshrl.u32 %v1308_v51, 16  ;;  %v1585_v45 = vshll.u32 %v1308_v51, 16  ;;  %v217_v51 = vld [vmem:[#allocation2 + $0x10c] sm:$0x8]  ;;  %v5485_v19 = vpop.permute.xlu1 %1636 }
  0xb3   : > { %v2190_v43 = vsel %vm2158_vm7, %v4908_v53, 0  ;;  %vm650_vm8 = vcmp.ne.s32.totalorder %v348_v14, 15  ;;  %v796_v22 = vand.u32 15, %v682_v23  ;;  %v2128_v39 = vrot.slane %v2123_v42, 4 }
  0xb4   : > { %v2127_v59 = vsel %vm4750_vm12, %v4678_v21, %v2126_v3  ;;  %v2333_v46 = vshll.u32 %v2190_v43, 16  ;;  %v2337_v16 = vshrl.u32 %v2190_v43, 16  ;;  %vm1259_vm9 = vmpackc.low %vm650_vm8, %vm650_vm8  ;;  %v5452_v10 = vrot.slane %v1582_v32, 7 }
  0xb5   : > { %vm2175_vm10 = vcmp.ne.s16.totalorder %v2127_v59, 0  ;;  %vm1098_vm13 = vcmp.ne.s32.totalorder %v796_v22, 0  ;;  %v1291_v61 = vsel %vm1259_vm9, %v4937_v54, 0  ;;  %v1427_v63 = vrot.slane %v5416_v6, 4 }
  0xb6   : > { %v2207_v53 = vsel %vm2175_vm10, %v4897_v38, 0  ;;  %v2335_v62 = vrot.slane %v2333_v46, 5  ;;  %v2339_v36 = vrot.slane %v2337_v16, 4  ;;  %v1429_v56 = vshrl.u32 %v1291_v61, 16  ;;  %vm1809_vm14 = vmpackc.low %vm1098_vm13, %vm1098_vm13 }
  0xb7   : > { %v2503_v26 = vshll.u32 %v2207_v53, 16  ;;  %v2507_v9 = vshrl.u32 %v2207_v53, 16  ;;  %v1432_v8 = vshll.u32 %v1291_v61, 16  ;;  %v1841_v37 = vsel %vm1809_vm14, 65537, %v4594_v2 }
  0xb8   : > { %v2336_v41 = vsel %vm4915_vm11, %v2331_v47, %v2335_v62  ;;  %v5460_v28 = vrot.slane %v1429_v56, 7  ;;  %v1977_v5 = vshrl.u32 %v1841_v37, 16  ;;  %v1980_v40 = vshll.u32 %v1841_v37, 16 }
  0xb9   : > { %v2505_v38 = vrot.slane %v2503_v26, 5  ;;  %v2509_v60 = vrot.slane %v2507_v9, 4  ;;  %2575 = vst.msk [vmem:[#allocation2 + $0x6c] sm:$0xf] %vm1149_vm2, %v2336_v41  ;;  %v1587_v12 = vor.u32 %v1585_v45, %v5452_v10  ;;  %v2340_v11 = vor.u32 %v2339_v36, %v2335_v62 }
  0xba   : > { %v1434_v50 = vor.u32 %v1432_v8, %v5460_v28  ;;  %v5469_v18 = vrot.slane %v1977_v5, 7  ;;  %v2136_v6 = vsel %vm4750_vm12, %v2128_v39, %v4676_v20  ;;  %vm214_vm4 = vcmask 519171  }
  0xbb   : > { %v2506_v57 = vsel %vm4915_vm11, %v2501_v33, %v2505_v38  ;;  %v2510_v48 = vor.u32 %v2509_v60, %v2505_v38  ;;  %v1588_v55 = vsel %vm4750_vm12, %v1580_v34, %v1587_v12  ;;  %vm2176_vm15 = vcmp.ne.s16.totalorder %v2136_v6, 0 }
  0xbc   : > { %2592 = vst.msk [vmem:[#allocation2 + $0xf4] sm:$0xf] %vm1149_vm2, %v2506_v57  ;;  %v1435_v47 = vsel %vm4750_vm12, %v1427_v63, %v1434_v50  ;;  %v1982_v42 = vor.u32 %v1980_v40, %v5469_v18  ;;  %v2208_v30 = vsel %vm2176_vm15, %v4948_v25, 0  ;;  %1658 = vrot.lane.b32.xlu0 %v1588_v55, %s4595_s21  ;;  %vm215_vm5 = vsmask.f32 7950  ;;  %v5491_v25 = vpop.permute.xlu0 %1602  ;;  %v1605_v9 = vpop.permute.xlu1 %1604 }
  0xbd   : > { %v2511_v7 = vrot.slane %v2510_v48, 4  ;;  %1624 = vrot.lane.b32.xlu1 %v1435_v47, %s4595_s21  ;;  %v2513_v33 = vshll.u32 %v2208_v30, 16  ;;  %v2341_v14 = vrot.slane %v2340_v11, 4  ;;  %vm216_vm6 = vmand %vm214_vm4, %vm215_vm5  ;;  %v252_v3 = vadd.s32 248, %v4640_v4  ;;  %v211_v57 = vld [vmem:[#allocation2 + $0x10] sm:$0x1] }
  0xbe   : > { %v1983_v23 = vsel %vm4750_vm12, %v4678_v21, %v1982_v42  ;;  %v218_v32 = vsel %vm216_vm6, 0, %v217_v51  ;;  %v1292_v43 = vsel %vm4629_vm1, %v5007_v31, 0  ;;  %v2517_v45 = vshrl.u32 %v2208_v30, 16 }
  0xbf   : > { %vm2159_vm7 = vcmp.ne.s16.totalorder %v1983_v23, 0  ;;  %v5493_v34 = vrot.slane %v2513_v33, 5  ;;  %219 = vst [vmem:[#allocation2 + $0x10c] sm:$0x8] %v218_v32  ;;  %v474_v59 = vand.u32 15, %v252_v3  ;;  %v700_v46 = vadd.s32 1, %v252_v3 }
  0xc0   : > { %v2191_v22 = vsel %vm2159_vm7, %v4937_v54, 0  ;;  %v1589_v39 = vrot.slane %v5452_v10, 4  ;;  %v1438_v1 = vshrl.u32 %v1292_v43, 16  ;;  %v1441_v62 = vshll.u32 %v1292_v43, 16  ;;  %v1639_v41 = vpop.permute.xlu0 %1638 }
  0xc1   : > { %v2343_v16 = vshll.u32 %v2191_v22, 16  ;;  %v2347_v61 = vshrl.u32 %v2191_v22, 16  ;;  %v2516_v4 = vsel %vm4915_vm11, %v2511_v7, %v5493_v34  ;;  %vm668_vm8 = vcmp.ne.s32.totalorder %v474_v59, 15 }
  0xc2   : > { %2593 = vst.msk [vmem:[#allocation2 + $0xfc] sm:$0xf] %vm1149_vm2, %v2516_v4  ;;  %v922_v53 = vand.u32 15, %v700_v46  ;;  %vm1277_vm1 = vmpackc.low %vm668_vm8, %vm668_vm8  ;;  %v1436_v56 = vrot.slane %v5460_v28, 4  ;;  %v1984_v26 = vrot.slane %v5469_v18, 4  ;;  %v1440_v37 = vrot.slane %v1438_v1, 7 }
  0xc3   : > { %v2345_v36 = vrot.slane %v2343_v16, 5  ;;  %v2349_v54 = vrot.slane %v2347_v61, 4  ;;  %v1309_v8 = vsel %vm1277_vm1, %v4989_v58, 0  ;;  %v1450_v10 = vshll.u32 %v4711_v35, 16  ;;  %v5581_v4 = vld [vmem:[#allocation2 + $0x94] ss:$8 sps:$4 sm:$0xff]  }
  0xc4   : > { %vm1116_vm9 = vcmp.ne.s32.totalorder %v922_v53, 0  ;;  %v5510_v5 = vrot.slane %v2517_v45, 4  ;;  %v1591_v38 = vshrl.u32 %v1309_v8, 16  ;;  %v1594_v60 = vshll.u32 %v1309_v8, 16  ;;  %v4523_v45 = vld [vmem:[%s6118_s1 + $0x38] sm:$0xff]   ;;  %v4531_v8 = vld [vmem:[%s6118_s1 + $0x28] sm:$0xff]  }
  0xc5   : > { %v2346_v63 = vsel %vm4915_vm11, %v2341_v14, %v2345_v36  ;;  %vm1827_vm10 = vmpackc.low %vm1116_vm9, %vm1116_vm9  ;;  %v2350_v40 = vor.u32 %v2349_v54, %v2345_v36  ;;  %v1443_v12 = vor.u32 %v1441_v62, %v1440_v37  ;;  %v1992_v11 = vsel %vm4750_vm12, %v1984_v26, %v4676_v20  ;;  %v5591_v36 = vld [vmem:[#allocation2 + $0xa4] ss:$8 sps:$4 sm:$0xff]  }
  0xc6   : > { %2576 = vst.msk [vmem:[#allocation2 + $0x74] sm:$0xf] %vm1149_vm2, %v2346_v63  ;;  %v1859_v28 = vsel %vm1827_vm10, 65537, %v4594_v2  ;;  %v1593_v35 = vrot.slane %v1591_v38, 7  ;;  %v1445_v6 = vrot.slane %v1440_v37, 4  ;;  %vm2160_vm13 = vcmp.ne.s16.totalorder %v1992_v11, 0  ;;  %v1641_v51 = vpop.permute.xlu1 %1640  ;;  %vm2596_vm9 = vmand %vm1149_vm2, %vm2210_vm0 }
  0xc7   : > { %v2139_v50 = vshrl.u32 %v1859_v28, 16  ;;  %v2142_v18 = vshll.u32 %v1859_v28, 16  ;;  %v1444_v48 = vsel %vm4750_vm12, %v1436_v56, %v1443_v12  ;;  %v1452_v55 = vor.u32 %v1450_v10, %v4738_v49  ;;  %v2597_v54 = vld [vmem:[#allocation2 + $0x10c] sm:$0xf]  ;;  %v4524_v37 = vld [vmem:[%s6118_s1 + $0xf8] sm:$0xff]   ;;  %v4530_v11 = vld [vmem:[%s6118_s1 + $0xf0] sm:$0xff]  }
  0xc8   : > { %vm208_vm14 = vcmask 1040896   ;;  %v1596_v47 = vor.u32 %v1594_v60, %v1593_v35  ;;  %v2192_v30 = vsel %vm2160_vm13, %v5007_v31, 0  ;;  %1626 = vrot.lane.b32.xlu0 %v1444_v48, %s4595_s21  ;;  %vm1694_vm4 = vcmask 1043968   ;;  %v5610_v10 = vld [vmem:[#allocation2 + $0x24] ss:$8 sps:$4 sm:$0xff]  }
  0xc9   : > { %v2141_v42 = vrot.slane %v2139_v50, 7  ;;  %vm5523_vm15 = vmand %vm208_vm14, %vm209_vm3  ;;  %v2351_v7 = vrot.slane %v2350_v40, 4  ;;  %v2353_v33 = vshll.u32 %v2192_v30, 16  ;;  %v2357_v14 = vshrl.u32 %v2192_v30, 16  ;;  %1716 = vst.msk [vmem:[#allocation2 + $0x90] sm:$0xf] %vm1694_vm4, %v5418_v24 }
  0xca   : > { %v212_v49 = vsel %vm5523_vm15, 0, %v211_v57  ;;  %1701 = vst.msk [vmem:[#allocation2 + $0x18] sm:$0xf] %vm1694_vm4, %v5466_v44  ;;  %1717 = vst.msk [vmem:[#allocation2 + $0x98] sm:$0xf] %vm1694_vm4, %v5444_v13  ;;  %v1607_v31 = vpop.permute.xlu0 %1606  ;;  %v2520_v24 = vor.u32 %v5510_v5, %v5493_v34  ;;  %v1597_v13 = vsel %vm4750_vm12, %v1589_v39, %v1596_v47  ;;  %vm201_vm3 = vcmask 1043456  }
  0xcb   : > { %1718 = vst.msk [vmem:[#allocation2 + $0xa0] sm:$0xf] %vm1694_vm4, %v5462_v29  ;;  %1719 = vst.msk [vmem:[#allocation2 + $0xa8] sm:$0xf] %vm1694_vm4, %v5485_v19  ;;  %v2144_v29 = vor.u32 %v2142_v18, %v2141_v42  ;;  %1660 = vrot.lane.b32.xlu1 %v1597_v13, %s4595_s21  ;;  %v2355_v44 = vrot.slane %v2353_v33, 5  ;;  %v2359_v19 = vrot.slane %v2357_v14, 4  ;;  %v1453_v3 = vsel %vm4750_vm12, %v1445_v6, %v1452_v55 }
  0xcc   : > { %1702 = vst.msk [vmem:[#allocation2 + $0x20] sm:$0xf] %vm1694_vm4, %v5491_v25  ;;  %1703 = vst.msk [vmem:[#allocation2 + $0x28] sm:$0xf] %vm1694_vm4, %v1605_v9  ;;  %vm202_vm5 = vcmask 523268   ;;  %vm2899_vm1 = vcmask 523264  }
  0xcd   : > { %1720 = vst.msk [vmem:[#allocation2 + $0xb0] sm:$0xf] %vm1694_vm4, %v1639_v41  ;;  %1721 = vst.msk [vmem:[#allocation2 + $0xb8] sm:$0xf] %vm1694_vm4, %v1641_v51  ;;  %v2145_v23 = vsel %vm4750_vm12, %v4678_v21, %v2144_v29  ;;  %vm1695_vm6 = vsmask.f32 7938  ;;  %v2356_v25 = vsel %vm4915_vm11, %v2351_v7, %v2355_v44  ;;  %v2360_v34 = vor.u32 %v2359_v19, %v2355_v44  ;;  %4278 = vmatprep.mubr.msk.bf16.mxu1 %vm2899_vm1, %v5581_v4 }
  0xce   : > { %213 = vst [vmem:[#allocation2 + $0x10] sm:$0x1] %v212_v49  ;;  %1704 = vst.msk [vmem:[#allocation2 + $0x30] sm:$0xf] %vm1694_vm4, %v1607_v31  ;;  %vm2177_vm8 = vcmp.ne.s16.totalorder %v2145_v23, 0  ;;  %v2521_v21 = vrot.slane %v2520_v24, 4 }
  0xcf   : > { %1150 = vst.msk [vmem:[#allocation2 + $0x10] sm:$0xf] %vm1149_vm2, %v4668_v15  ;;  %vm203_vm7 = vmor %vm202_vm5, %vm201_vm3  ;;  %v2209_v15 = vsel %vm2177_vm8, %v4989_v58, 0  ;;  %v2361_v43 = vrot.slane %v2360_v34, 4  ;;  %1628 = vrot.lane.b32.xlu1 %v1453_v3, %s4595_s21  ;;  %v5615_v63 = vld [vmem:[#allocation2 + $0xb4] ss:$8 sps:$4 sm:$0xff]  }
  0xd0   : > { %204 = vst.msk [vmem:[#allocation2] sm:$0xff] %vm203_vm7, %v4594_v2  ;;  %205 = vst.msk [vmem:[#allocation2 + $0x8] sm:$0xff] %vm203_vm7, %v4594_v2  ;;  %v2523_v52 = vshll.u32 %v2209_v15, 16  ;;  %v2527_v32 = vshrl.u32 %v2209_v15, 16  ;;  %v1643_v59 = vpop.permute.xlu0 %1642  ;;  %v5619_v38 = vld [vmem:[#allocation2 + $0x14] ss:$8 sps:$4 sm:$0xff]  }
  0xd1   : > { %206 = vst.msk [vmem:[#allocation2 + $0x110] sm:$0xff] %vm203_vm7, %v4594_v2  ;;  %207 = vst.msk [vmem:[#allocation2 + $0x118] sm:$0xff] %vm203_vm7, %v4594_v2  ;;  %v2366_v16 = vsel %vm4915_vm11, %v2361_v43, %v4866_v0  ;;  %v5579_v61 = vld [vmem:[#allocation2 + $0x90] ss:$8 sps:$4 sm:$0xff]   ;;  %4270 = vmatprep.mubr.msk.bf16.mxu0 %vm2899_vm1, %v5619_v38  ;;  %v4537_v40 = vld [vmem:[%s6118_s1 + $0x20] sm:$0xff]  }
  0xd2   : > { %2577 = vst.msk [vmem:[#allocation2 + $0x7c] sm:$0xf] %vm1149_vm2, %v2356_v25  ;;  %vm5568_vm12 = vmand %vm1694_vm4, %vm1695_vm6  ;;  %v2525_v58 = vrot.slane %v2523_v52, 5  ;;  %v2529_v46 = vrot.slane %v2527_v32, 4  ;;  %3045 = vmatmul.mubr.bf16.vlgmr.msra.gmra.mxu1 %v5579_v61  ;;  %v2620_v56 = vld [vmem:[#allocation2 + $0xa0] sm:$0xff]  ;;  %v2621_v9 = vld [vmem:[#allocation2 + $0xa8] sm:$0xff] }
  0xd3   : > { %1722 = vst.msk [vmem:[#allocation2 + $0xc0] sm:$0xf] %vm1694_vm4, %v1643_v59  ;;  %3194 = vmatpush1.bf16.msra.mxu1 %v4523_v45  ;;  %4279 = vmatprep.mubr.msk.bf16.mxu1 %vm2899_vm1, %v5591_v36  ;;  %v5612_v41 = vcombine.low %v2620_v56, %v2621_v9  ;;  %v2604_v28 = vld [vmem:[#allocation2 + $0x20] sm:$0xff]  ;;  %v2605_v35 = vld [vmem:[#allocation2 + $0x28] sm:$0xff]  ;;  %v4541_v6 = vld [vmem:[%s6118_s1 + $0x18] sm:$0xff]  }
  0xd4   : > { %2578 = vst.msk [vmem:[#allocation2 + $0x84] sm:$0xf] %vm1149_vm2, %v2366_v16  ;;  %v2526_v53 = vsel %vm4915_vm11, %v2521_v21, %v2525_v58  ;;  %v2530_v1 = vor.u32 %v2529_v46, %v2525_v58  ;;  %v1609_v0 = vpop.permute.xlu1 %1608  ;;  %3195 = vmatprep.subr.bf16.mxu1 %v4594_v2  ;;  %v2622_v50 = vld [vmem:[#allocation2 + $0xb0] sm:$0xff]  ;;  %v2623_v18 = vld [vmem:[#allocation2 + $0xb8] sm:$0xff]  ;;  %v5642_v57 = vcombine.low %v2604_v28, %v2605_v35  ;;  %v4534_v55 = vld [vmem:[%s6118_s1 + $0xe8] sm:$0xff]  }
  0xd5   : > { %2594 = vst.msk [vmem:[#allocation2 + $0x104] sm:$0xf] %vm1149_vm2, %v2526_v53  ;;  %v5644_v48 = vcombine.low %v2622_v50, %v2623_v18  ;;  %v5650_v47 = vld [vmem:[#allocation2 + $0x34] ss:$8 sps:$4 sm:$0xff]   ;;  %v4538_v20 = vld [vmem:[%s6118_s1 + $0xe0] sm:$0xff]   ;;  %v4551_v31 = vld [vmem:[%s6118_s1 + $0x8] sm:$0xff]  }
  0xd6   : > { %v1697_v39 = vld [vmem:[#allocation2 + $0x10] sm:$0xf]  ;;  %1705 = vst.msk [vmem:[#allocation2 + $0x38] sm:$0xf] %vm1694_vm4, %v1609_v0  ;;  %v2531_v27 = vrot.slane %v2530_v1, 4  ;;  %v4544_v44 = vld [vmem:[%s6118_s1 + $0xd8] sm:$0xff]  }
  0xd7   : > { %v1698_v62 = vsel %vm5568_vm12, %v5447_v17, %v1697_v39  ;;  %v4527_v17 = vld [vmem:[%s6118_s1 + $0x30] sm:$0xff]   ;;  %v5661_v51 = vld [vmem:[#allocation2 + $0xc4] ss:$8 sps:$4 sm:$0xff]   ;;  %v4559_v25 = vld [vmem:[%s6118_s1 + $0x58] sm:$0xff]  }
  0xd8   : > { %1699 = vst [vmem:[#allocation2 + $0x10] sm:$0xf] %v1698_v62  ;;  %v2598_v26 = vsel %vm2596_vm9, %v2531_v27, %v2597_v54  ;;  %3196 = vmatpush1.bf16.msra.mxu1 %v4527_v17  ;;  %v4545_v42 = vld [vmem:[%s6118_s1 + $0x10] sm:$0xff]   ;;  %v4555_v19 = vld [vmem:[%s6118_s1] sm:$0xff]   ;;  %v4552_v32 = vld [vmem:[%s6118_s1 + $0xc8] sm:$0xff]  }
  0xd9   : > { %2599 = vst [vmem:[#allocation2 + $0x10c] sm:$0xf] %v2598_v26  ;;  %3197 = vmatprep.subr.bf16.mxu1 %v4594_v2  ;;  %v2606_v30 = vld [vmem:[#allocation2 + $0x30] sm:$0xff]  ;;  %v5696_v15 = vld [vmem:[#allocation2 + $0x44] ss:$8 sps:$4 sm:$0xff]   ;;  %v4562_v58 = vld [vmem:[%s6118_s1 + $0x118] sm:$0xff]  }
  0xda   : > { %3053 = vmatmul.mubr.bf16.gmra.mxu1 %v5612_v41  ;;  %v2624_v14 = vld [vmem:[#allocation2 + $0xc0] sm:$0xff]  ;;  %v4548_v23 = vld [vmem:[%s6118_s1 + $0xd0] sm:$0xff]   ;;  %v4571_v59 = vld [vmem:[%s6118_s1 + $0x48] sm:$0xff]  }
  0xdb   : > { %4280 = vmatprep.mubr.msk.bf16.mxu1 %vm2899_vm1, %v5615_v63  ;;  %v4567_v43 = vld [vmem:[%s6118_s1 + $0x50] sm:$0xff]   ;;  %v4558_v45 = vld [vmem:[%s6118_s1 + $0xc0] sm:$0xff]   ;;  %v4576_v27 = vld [vmem:[%s6118_s1 + $0x108] sm:$0xff]  }
  0xdc   : > { %v1611_v60 = vpop.permute.xlu0 %1610  ;;  %3198 = vmatpush1.bf16.msra.mxu1 %v4531_v8  ;;  %v5726_v53 = vld [vmem:[#allocation2 + $0xd4] ss:$8 sps:$4 sm:$0xff]   ;;  %v4577_v1 = vld [vmem:[%s6118_s1 + $0x40] sm:$0xff]  }
  0xdd   : > { %1706 = vst.msk [vmem:[#allocation2 + $0x40] sm:$0xf] %vm1694_vm4, %v1611_v60  ;;  %3199 = vmatprep.subr.bf16.mxu1 %v4594_v2  ;;  %v2607_v7 = vld [vmem:[#allocation2 + $0x38] sm:$0xff]  ;;  %v4568_v0 = vld [vmem:[%s6118_s1 + $0x110] sm:$0xff]   ;;  %v4578_v8 = vld [vmem:[%s6118_s1 + $0x100] sm:$0xff]  }
  0xde   : > { %v5673_v13 = vcombine.low %v2606_v30, %v2607_v7  ;;  %v5747_v26 = vld [vmem:[#allocation2 + $0x54] ss:$8 sps:$4 sm:$0xff]  }
  0xdf   : > { %v5617_v5 = vld [vmem:[#allocation2 + $0x10] ss:$8 sps:$4 sm:$0xff]   ;;  %v1645_v12 = vpop.permute.xlu1 %1644 }
  0xe0   : > { %2981 = vmatmul.mubr.bf16.vlgmr.msra.gmra.mxu0 %v5617_v5  ;;  %1723 = vst.msk [vmem:[#allocation2 + $0xc8] sm:$0xf] %vm1694_vm4, %v1645_v12  ;;  %3200 = vmatpush1.bf16.msra.mxu1 %v4537_v40  ;;  %v5760_v12 = vld [vmem:[#allocation2 + $0xe4] ss:$8 sps:$4 sm:$0xff]  }
  0xe1   : > { %3676 = vmatpush1.bf16.msra.mxu0 %v4524_v37  ;;  %4271 = vmatprep.mubr.msk.bf16.mxu0 %vm2899_vm1, %v5610_v10 }
  0xe2   : > { %3677 = vmatprep.subr.bf16.mxu0 %v4594_v2  ;;  %3201 = vmatprep.subr.bf16.mxu1 %v4594_v2 }
  0xe3   : > { %3061 = vmatmul.mubr.bf16.gmra.mxu1 %v5644_v48 }
  0xe4   : > { %3202 = vmatpush1.bf16.msra.mxu1 %v4541_v6  ;;  %4281 = vmatprep.mubr.msk.bf16.mxu1 %vm2899_vm1, %v5661_v51  ;;  %v2608_v3 = vld [vmem:[#allocation2 + $0x40] sm:$0xff] }
  0xe5   : > { %3678 = vmatpush1.bf16.msra.mxu0 %v4530_v11  ;;  %3203 = vmatprep.subr.bf16.mxu1 %v4594_v2  ;;  %v4556_v6 = vld [vmem:[#allocation2 + $0x64] ss:$8 sps:$4 sm:$0xff]  }
  0xe6   : > { %3679 = vmatprep.subr.bf16.mxu0 %v4594_v2 }
  0xe7   : > { %v2625_v49 = vld [vmem:[#allocation2 + $0xc8] sm:$0xff] }
  0xe8   : > { %2989 = vmatmul.mubr.bf16.gmra.mxu0 %v5642_v57  ;;  %v1647_v33 = vpop.permute.xlu0 %1646  ;;  %3204 = vmatpush1.bf16.msra.mxu1 %v4545_v42  ;;  %v5675_v29 = vcombine.low %v2624_v14, %v2625_v49  ;;  %v4563_v49 = vld [vmem:[#allocation2 + $0x74] ss:$8 sps:$4 sm:$0xff]  }
  0xe9   : > { %3680 = vmatpush1.bf16.msra.mxu0 %v4534_v55  ;;  %4272 = vmatprep.mubr.msk.bf16.mxu0 %vm2899_vm1, %v5650_v47  ;;  %1724 = vst.msk [vmem:[#allocation2 + $0xd0] sm:$0xf] %vm1694_vm4, %v1647_v33 }
  0xea   : > { %3681 = vmatprep.subr.bf16.mxu0 %v4594_v2  ;;  %3205 = vmatprep.subr.bf16.mxu1 %v4594_v2 }
  0xeb   : > { %v1613_v24 = vpop.permute.xlu1 %1612  ;;  %3069 = vmatmul.mubr.bf16.gmra.mxu1 %v5675_v29 }
  0xec   : > { %1707 = vst.msk [vmem:[#allocation2 + $0x48] sm:$0xf] %vm1694_vm4, %v1613_v24  ;;  %3206 = vmatpush1.bf16.msra.mxu1 %v4551_v31  ;;  %4282 = vmatprep.mubr.msk.bf16.mxu1 %vm2899_vm1, %v5726_v53 }
  0xed   : > { %3682 = vmatpush1.bf16.msra.mxu0 %v4538_v20  ;;  %3207 = vmatprep.subr.bf16.mxu1 %v4594_v2  ;;  %v5772_v20 = vld [vmem:[#allocation2 + $0xf4] ss:$8 sps:$4 sm:$0xff]  }
  0xee   : > { %3683 = vmatprep.subr.bf16.mxu0 %v4594_v2 }
  0xf0   : > { %2997 = vmatmul.mubr.bf16.gmra.mxu0 %v5673_v13  ;;  %3208 = vmatpush1.bf16.msra.mxu1 %v4555_v19  ;;  %v2626_v46 = vld [vmem:[#allocation2 + $0xd0] sm:$0xff] }
  0xf1   : > { %3684 = vmatpush1.bf16.msra.mxu0 %v4544_v44  ;;  %3217 = vmatprep.subr.bf16.mxu1 %v4594_v2 }
  0xf2   : > { %3685 = vmatprep.subr.bf16.mxu0 %v4594_v2  ;;  %4273 = vmatprep.mubr.msk.bf16.mxu0 %vm2899_vm1, %v5696_v15 }
  0xf3   : > { %v2609_v34 = vld [vmem:[#allocation2 + $0x48] sm:$0xff] }
  0xf4   : > { %v1615_v21 = vpop.permute.xlu0 %1614  ;;  %v5699_v52 = vcombine.low %v2608_v3, %v2609_v34  ;;  %3218 = vmatpush2.bf16.msra.mxu1 %v4559_v25  ;;  %v4581_v3 = vld [vmem:[#allocation2 + $0x4] ss:$8 sps:$4 sm:$0xff]  }
  0xf5   : > { %3686 = vmatpush1.bf16.msra.mxu0 %v4548_v23  ;;  %1708 = vst.msk [vmem:[#allocation2 + $0x50] sm:$0xf] %vm1694_vm4, %v1615_v21  ;;  %3219 = vmatprep.subr.bf16.mxu1 %v4594_v2  ;;  %v5785_v23 = vld [vmem:[#allocation2 + $0x104] ss:$8 sps:$4 sm:$0xff]  }
  0xf6   : > { %3687 = vmatprep.subr.bf16.mxu0 %v4594_v2  ;;  %v4572_v34 = vld [vmem:[#allocation2 + $0x84] ss:$8 sps:$4 sm:$0xff]  }
  0xf7   : > { %v1649_v22 = vpop.permute.xlu1 %1648 }
  0xf8   : > { %3005 = vmatmul.mubr.bf16.gmra.mxu0 %v5699_v52  ;;  %1725 = vst.msk [vmem:[#allocation2 + $0xd8] sm:$0xf] %vm1694_vm4, %v1649_v22  ;;  %3220 = vmatpush2.bf16.msra.mxu1 %v4567_v43 }
  0xf9   : > { %3688 = vmatpush1.bf16.msra.mxu0 %v4552_v32  ;;  %3221 = vmatprep.subr.bf16.mxu1 %v4594_v2  ;;  %v4579_v32 = vld [vmem:[#allocation2] ss:$8 sps:$4 sm:$0xff]  }
  0xfa   : > { %3689 = vmatprep.subr.bf16.mxu0 %v4594_v2  ;;  %4274 = vmatprep.mubr.msk.bf16.mxu0 %vm2899_vm1, %v5747_v26 }
  0xfc   : > { %3222 = vmatpush2.bf16.msra.mxu1 %v4571_v59  ;;  %v2610_v17 = vld [vmem:[#allocation2 + $0x50] sm:$0xff] }
  0xfd   : > { %3690 = vmatpush1.bf16.msra.mxu0 %v4558_v45  ;;  %3223 = vmatprep.subr.bf16.mxu1 %v4594_v2 }
  0xfe   : > { %3699 = vmatprep.subr.bf16.mxu0 %v4594_v2 }
  0xff   : > { %v1617_v16 = vpop.permute.xlu1 %1616  ;;  %v2627_v39 = vld [vmem:[#allocation2 + $0xd8] sm:$0xff] }
 0x100   : > { %1709 = vst.msk [vmem:[#allocation2 + $0x58] sm:$0xf] %vm1694_vm4, %v1617_v16  ;;  %v5733_v62 = vcombine.low %v2626_v46, %v2627_v39  ;;  %3224 = vmatpush2.bf16.msra.mxu1 %v4577_v1 }
 0x101   : > { %3700 = vmatpush2.bf16.msra.mxu0 %v4562_v58 }
 0x102   : > { %3701 = vmatprep.subr.bf16.mxu0 %v4594_v2  ;;  %v1651_v54 = vpop.permute.xlu0 %1650  ;;  %3077 = vmatmul.mubr.bf16.gmra.mxu1 %v5733_v62 }
 0x103   : > { %1726 = vst.msk [vmem:[#allocation2 + $0xe0] sm:$0xf] %vm1694_vm4, %v1651_v54  ;;  %4283 = vmatprep.mubr.msk.bf16.mxu1 %vm2899_vm1, %v5760_v12 }
 0x105   : > { %3702 = vmatpush2.bf16.msra.mxu0 %v4568_v0 }
 0x106   : > { %3703 = vmatprep.subr.bf16.mxu0 %v4594_v2 }
 0x107   : > { %v2611_v56 = vld [vmem:[#allocation2 + $0x58] sm:$0xff] }
 0x108   : > { %v5749_v9 = vcombine.low %v2610_v17, %v2611_v56 }
 0x109   : > { %3704 = vmatpush2.bf16.msra.mxu0 %v4576_v27 }
 0x10a   : > { %3705 = vmatprep.subr.bf16.mxu0 %v4594_v2  ;;  %3013 = vmatmul.mubr.bf16.gmra.mxu0 %v5749_v9  ;;  %v2628_v40 = vld [vmem:[#allocation2 + $0xe0] sm:$0xff] }
 0x10b   : > { %4275 = vmatprep.mubr.msk.bf16.mxu0 %vm2899_vm1, %v4556_v6 }
 0x10c   : > { %v1619_v37 = vpop.permute.xlu0 %1618 }
 0x10d   : > { %3706 = vmatpush2.bf16.msra.mxu0 %v4578_v8  ;;  %v1653_v60 = vpop.permute.xlu1 %1652  ;;  %1710 = vst.msk [vmem:[#allocation2 + $0x60] sm:$0xf] %vm1694_vm4, %v1619_v37 }
 0x10e   : > { %1727 = vst.msk [vmem:[#allocation2 + $0xe8] sm:$0xf] %vm1694_vm4, %v1653_v60 }
 0x114   : > { %v2612_v50 = vld [vmem:[#allocation2 + $0x60] sm:$0xff] }
 0x115   : > { %v2629_v28 = vld [vmem:[#allocation2 + $0xe8] sm:$0xff] }
 0x116   : > { %v5762_v11 = vcombine.low %v2628_v40, %v2629_v28  ;;  %v4584_v40 = vld [vmem:[#allocation2 + $0x110] ss:$8 sps:$4 sm:$0xff]  }
 0x117   : > { %v1621_v35 = vpop.permute.xlu1 %1620 }
 0x118   : > { %1711 = vst.msk [vmem:[#allocation2 + $0x68] sm:$0xf] %vm1694_vm4, %v1621_v35  ;;  %3085 = vmatmul.mubr.bf16.gmra.mxu1 %v5762_v11 }
 0x119   : > { %4284 = vmatprep.mubr.msk.bf16.mxu1 %vm2899_vm1, %v5772_v20 }
 0x11a   : > { %v1655_v2 = vpop.permute.xlu0 %1654 }
 0x11b   : > { %1728 = vst.msk [vmem:[#allocation2 + $0xf0] sm:$0xf] %vm1694_vm4, %v1655_v2 }
 0x11f   : > { %v2613_v18 = vld [vmem:[#allocation2 + $0x68] sm:$0xff] }
 0x120   : > { %v4236_v55 = vcombine.low %v2612_v50, %v2613_v18 }
 0x122   : > { %3021 = vmatmul.mubr.bf16.gmra.mxu0 %v4236_v55 }
 0x123   : > { %v1623_v42 = vpop.permute.xlu0 %1622  ;;  %4276 = vmatprep.mubr.msk.bf16.mxu0 %vm2899_vm1, %v4563_v49 }
 0x124   : > { %v1657_v30 = vpop.permute.xlu1 %1656  ;;  %1712 = vst.msk [vmem:[#allocation2 + $0x70] sm:$0xf] %vm1694_vm4, %v1623_v42 }
 0x125   : > { %1729 = vst.msk [vmem:[#allocation2 + $0xf8] sm:$0xf] %vm1694_vm4, %v1657_v30 }
 0x12c   : > { %v5774_v7 = vld [vmem:[#allocation2 + $0xf0] ss:$8 sps:$4 sm:$0xff]  }
 0x12d   : > { %3093 = vmatmul.mubr.bf16.gmra.mxu1 %v5774_v7 }
 0x12e   : > { %v1659_v33 = vpop.permute.xlu0 %1658  ;;  %4285 = vmatprep.mubr.msk.bf16.mxu1 %vm2899_vm1, %v5785_v23 }
 0x12f   : > { %v1625_v14 = vpop.permute.xlu1 %1624  ;;  %1730 = vst.msk [vmem:[#allocation2 + $0x100] sm:$0xf] %vm1694_vm4, %v1659_v33 }
 0x130   : > { %1713 = vst.msk [vmem:[#allocation2 + $0x78] sm:$0xf] %vm1694_vm4, %v1625_v14 }
 0x137   : > { %v4565_v31 = vld [vmem:[#allocation2 + $0x70] ss:$8 sps:$4 sm:$0xff]  }
 0x138   : > { %3029 = vmatmul.mubr.bf16.gmra.mxu0 %v4565_v31 }
 0x139   : > { %4277 = vmatprep.mubr.msk.bf16.mxu0 %vm2899_vm1, %v4572_v34 }
 0x13a   : > { %v1627_v24 = vpop.permute.xlu0 %1626 }
 0x13b   : > { %1714 = vst.msk [vmem:[#allocation2 + $0x80] sm:$0xf] %vm1694_vm4, %v1627_v24 }
 0x13d   : > { %v1661_v44 = vpop.permute.xlu1 %1660 }
 0x13e   : > { %1731 = vst.msk [vmem:[#allocation2 + $0x108] sm:$0xf] %vm1694_vm4, %v1661_v44 }
 0x141   : > { %v1629_v19 = vpop.permute.xlu1 %1628 }
 0x142   : > { %1715 = vst.msk [vmem:[#allocation2 + $0x88] sm:$0xf] %vm1694_vm4, %v1629_v19 }
 0x145   : > { %v5787_v25 = vld [vmem:[#allocation2 + $0x100] ss:$8 sps:$4 sm:$0xff]  }
 0x146   : > { %3101 = vmatmul.mubr.bf16.gmra.mxu1 %v5787_v25 }
 0x147   : > { %4300 = vmatprep.mubr.msk.bf16.mxu1 %vm2899_vm1, %v4581_v3 }
 0x149   : > { %v4574_v21 = vld [vmem:[#allocation2 + $0x80] ss:$8 sps:$4 sm:$0xff]  }
 0x14a   : > { %3037 = vmatmul.mubr.bf16.gmra.mxu0 %v4574_v21 }
 0x14b   : > { %4384 = vmatprep.mubr.msk.bf16.mxu0 %vm2899_vm1, %v5610_v10 }
 0x14e   : > { %3226 = vmatmul.mubr.bf16.vlgmr.msra.gmra.mxu1 %v4579_v32 }
 0x14f   : > { %4301 = vmatprep.mubr.msk.bf16.mxu1 %vm2899_vm1, %v5619_v38 }
 0x152   : > { %3708 = vmatmul.mubr.bf16.vlgmr.msra.gmra.mxu0 %v5642_v57 }
 0x153   : > { %4385 = vmatprep.mubr.msk.bf16.mxu0 %vm2899_vm1, %v5650_v47 }
 0x156   : > { %3234 = vmatmul.mubr.bf16.gmra.mxu1 %v5617_v5 }
 0x157   : > { %4302 = vmatprep.mubr.msk.bf16.mxu1 %vm2899_vm1, %v5610_v10 }
 0x15a   : > { %3716 = vmatmul.mubr.bf16.gmra.mxu0 %v5673_v13 }
 0x15b   : > { %4386 = vmatprep.mubr.msk.bf16.mxu0 %vm2899_vm1, %v5696_v15 }
 0x15e   : > { %3242 = vmatmul.mubr.bf16.gmra.mxu1 %v5642_v57 }
 0x15f   : > { %4303 = vmatprep.mubr.msk.bf16.mxu1 %vm2899_vm1, %v5650_v47 }
 0x162   : > { %3724 = vmatmul.mubr.bf16.gmra.mxu0 %v5699_v52 }
 0x163   : > { %4387 = vmatprep.mubr.msk.bf16.mxu0 %vm2899_vm1, %v5747_v26 }
 0x166   : > { %3250 = vmatmul.mubr.bf16.gmra.mxu1 %v5673_v13 }
 0x167   : > { %4304 = vmatprep.mubr.msk.bf16.mxu1 %vm2899_vm1, %v5696_v15 }
 0x16a   : > { %3732 = vmatmul.mubr.bf16.gmra.mxu0 %v5749_v9 }
 0x16b   : > { %4388 = vmatprep.mubr.msk.bf16.mxu0 %vm2899_vm1, %v4556_v6 }
 0x16e   : > { %3258 = vmatmul.mubr.bf16.gmra.mxu1 %v5699_v52 }
 0x16f   : > { %4305 = vmatprep.mubr.msk.bf16.mxu1 %vm2899_vm1, %v5747_v26 }
 0x172   : > { %3740 = vmatmul.mubr.bf16.gmra.mxu0 %v4236_v55 }
 0x173   : > { %4389 = vmatprep.mubr.msk.bf16.mxu0 %vm2899_vm1, %v4563_v49 }
 0x176   : > { %3266 = vmatmul.mubr.bf16.gmra.mxu1 %v5749_v9  ;;  %v4582_v9 = vld [vmem:[#allocation2 + $0x114] ss:$8 sps:$4 sm:$0xff]  }
 0x177   : > { %4306 = vmatprep.mubr.msk.bf16.mxu1 %vm2899_vm1, %v4556_v6 }
 0x17a   : > { %3748 = vmatmul.mubr.bf16.gmra.mxu0 %v4565_v31 }
 0x17b   : > { %4390 = vmatprep.mubr.msk.bf16.mxu0 %vm2899_vm1, %v4572_v34 }
 0x17e   : > { %3274 = vmatmul.mubr.bf16.gmra.mxu1 %v4236_v55 }
 0x17f   : > { %4307 = vmatprep.mubr.msk.bf16.mxu1 %vm2899_vm1, %v4563_v49 }
 0x182   : > { %3756 = vmatmul.mubr.bf16.gmra.mxu0 %v4574_v21 }
 0x183   : > { %4391 = vmatprep.mubr.msk.bf16.mxu0 %vm2899_vm1, %v5581_v4 }
 0x186   : > { %3282 = vmatmul.mubr.bf16.gmra.mxu1 %v4565_v31 }
 0x187   : > { %4308 = vmatprep.mubr.msk.bf16.mxu1 %vm2899_vm1, %v4572_v34 }
 0x18a   : > { %3764 = vmatmul.mubr.bf16.gmra.mxu0 %v5579_v61 }
 0x18b   : > { %4392 = vmatprep.mubr.msk.bf16.mxu0 %vm2899_vm1, %v5591_v36 }
 0x18e   : > { %3290 = vmatmul.mubr.bf16.gmra.mxu1 %v4574_v21 }
 0x18f   : > { %4309 = vmatprep.mubr.msk.bf16.mxu1 %vm2899_vm1, %v5581_v4 }
 0x192   : > { %3772 = vmatmul.mubr.bf16.gmra.mxu0 %v5612_v41  ;;  %v5835_v10 = vpop.f32.mrf.mxu1 }
 0x193   : > { %4393 = vmatprep.mubr.msk.bf16.mxu0 %vm2899_vm1, %v5615_v63 }
 0x194   : > { %v3048_v5 = vpop.f32.mrf.mxu1 }
 0x196   : > { %3298 = vmatmul.mubr.bf16.gmra.mxu1 %v5579_v61  ;;  %v5840_v38 = vpop.f32.mrf.mxu1 }
 0x197   : > { %4310 = vmatprep.mubr.msk.bf16.mxu1 %vm2899_vm1, %v5591_v36 }
 0x198   : > { %v3051_v57 = vpop.f32.mrf.mxu1 }
 0x19a   : > { %3780 = vmatmul.mubr.bf16.gmra.mxu0 %v5644_v48  ;;  %v5845_v47 = vpop.f32.mrf.mxu1 }
 0x19b   : > { %4394 = vmatprep.mubr.msk.bf16.mxu0 %vm2899_vm1, %v5661_v51 }
 0x19c   : > { %v3056_v13 = vpop.f32.mrf.mxu1 }
 0x19e   : > { %3306 = vmatmul.mubr.bf16.gmra.mxu1 %v5612_v41  ;;  %v5852_v61 = vpop.f32.mrf.mxu1 }
 0x19f   : > { %4311 = vmatprep.mubr.msk.bf16.mxu1 %vm2899_vm1, %v5615_v63 }
 0x1a0   : > { %v5849_v4 = vpop.f32.mrf.mxu0  ;;  %v3059_v52 = vpop.f32.mrf.mxu1 }
 0x1a2   : > { %v2984_v15 = vpop.f32.mrf.mxu0  ;;  %3788 = vmatmul.mubr.bf16.gmra.mxu0 %v5675_v29 }
 0x1a3   : > { %v5859_v22 = vpop.f32.mrf.mxu1  ;;  %4395 = vmatprep.mubr.msk.bf16.mxu0 %vm2899_vm1, %v5726_v53 }
 0x1a4   : > { %v5856_v36 = vpop.f32.mrf.mxu0 }
 0x1a5   : > { %v3064_v41 = vpop.f32.mrf.mxu1 }
 0x1a6   : > { %v2987_v43 = vpop.f32.mrf.mxu0  ;;  %3314 = vmatmul.mubr.bf16.gmra.mxu1 %v5644_v48  ;;  %v5941_v41 = vld [vmem:[%s6119_s2] ss:$0 sm:$0xff] }
 0x1a7   : > { %v5866_v58 = vpop.f32.mrf.mxu1  ;;  %4312 = vmatprep.mubr.msk.bf16.mxu1 %vm2899_vm1, %v5661_v51 }
 0x1a8   : > { %v5863_v45 = vpop.f32.mrf.mxu0 }
 0x1a9   : > { %v3067_v46 = vpop.f32.mrf.mxu1 }
 0x1aa   : > { %v2992_v59 = vpop.f32.mrf.mxu0  ;;  %3796 = vmatmul.mubr.bf16.gmra.mxu0 %v5733_v62 }
 0x1ab   : > { %v5873_v39 = vpop.f32.mrf.mxu1  ;;  %4396 = vmatprep.mubr.msk.bf16.mxu0 %vm2899_vm1, %v5760_v12 }
 0x1ac   : > { %v5870_v63 = vpop.f32.mrf.mxu0 }
 0x1ad   : > { %v3072_v48 = vpop.f32.mrf.mxu1 }
 0x1ae   : > { %v2995_v16 = vpop.f32.mrf.mxu0  ;;  %3322 = vmatmul.mubr.bf16.gmra.mxu1 %v5675_v29  ;;  %v5947_v48 = vld [vmem:[%s6120_s3] ss:$0 sm:$0xff] }
 0x1af   : > { %v5880_v54 = vpop.f32.mrf.mxu1  ;;  %4313 = vmatprep.mubr.msk.bf16.mxu1 %vm2899_vm1, %v5726_v53 }
 0x1b0   : > { %v5877_v1 = vpop.f32.mrf.mxu0 }
 0x1b1   : > { %v3075_v27 = vpop.f32.mrf.mxu1 }
 0x1b2   : > { %v3000_v0 = vpop.f32.mrf.mxu0  ;;  %3804 = vmatmul.mubr.bf16.gmra.mxu0 %v5762_v11 }
 0x1b3   : > { %4397 = vmatprep.mubr.msk.bf16.mxu0 %vm2899_vm1, %v5772_v20 }
 0x1b4   : > { %v5884_v51 = vpop.f32.mrf.mxu0 }
 0x1b6   : > { %v3003_v17 = vpop.f32.mrf.mxu0  ;;  %3330 = vmatmul.mubr.bf16.gmra.mxu1 %v5733_v62 }
 0x1b7   : > { %4314 = vmatprep.mubr.msk.bf16.mxu1 %vm2899_vm1, %v5760_v12 }
 0x1b8   : > { %v5889_v56 = vpop.f32.mrf.mxu0 }
 0x1ba   : > { %v3008_v29 = vpop.f32.mrf.mxu0  ;;  %3812 = vmatmul.mubr.bf16.gmra.mxu0 %v5774_v7 }
 0x1bb   : > { %4398 = vmatprep.mubr.msk.bf16.mxu0 %vm2899_vm1, %v5785_v23 }
 0x1bc   : > { %v5894_v26 = vpop.f32.mrf.mxu0 }
 0x1be   : > { %v3011_v53 = vpop.f32.mrf.mxu0  ;;  %3338 = vmatmul.mubr.bf16.gmra.mxu1 %v5762_v11 }
 0x1bf   : > { %4315 = vmatprep.mubr.msk.bf16.mxu1 %vm2899_vm1, %v5772_v20 }
 0x1c2   : > { %v5902_v8 = vpop.f32.mrf.mxu1  ;;  %3820 = vmatmul.mubr.bf16.gmra.mxu0 %v5787_v25 }
 0x1c3   : > { %4399 = vmatprep.mubr.msk.bf16.mxu0 %vm2899_vm1, %v4582_v9 }
 0x1c4   : > { %v3080_v62 = vpop.f32.mrf.mxu1 }
 0x1c6   : > { %v5906_v37 = vpop.f32.mrf.mxu1  ;;  %3346 = vmatmul.mubr.bf16.gmra.mxu1 %v5774_v7 }
 0x1c8   : > { %v3083_v60 = vpop.f32.mrf.mxu1 }
 0x1ca   : > { %v5909_v28 = vpop.f32.mrf.mxu0  ;;  %3828 = vmatmul.mubr.bf16.gmra.mxu0 %v4584_v40 }
 0x1cc   : > { %v3016_v12 = vpop.f32.mrf.mxu0 }
 0x1ce   : > { %v5911_v11 = vpop.f32.mrf.mxu0 }
 0x1d0   : > { %v3019_v35 = vpop.f32.mrf.mxu0 }
 0x1d8   : > { %v5913_v2 = vpop.f32.mrf.mxu1 }
 0x1da   : > { %v3088_v50 = vpop.f32.mrf.mxu1 }
 0x1dc   : > { %v5915_v18 = vpop.f32.mrf.mxu1 }
 0x1de   : > { %v3091_v6 = vpop.f32.mrf.mxu1 }
 0x1e2   : > { %v5917_v55 = vpop.f32.mrf.mxu0 }
 0x1e4   : > { %v3024_v42 = vpop.f32.mrf.mxu0 }
 0x1e6   : > { %v5919_v30 = vpop.f32.mrf.mxu0 }
 0x1e8   : > { %v3027_v20 = vpop.f32.mrf.mxu0 }
 0x1ed   : > { %v5921_v7 = vpop.f32.mrf.mxu1 }
 0x1ef   : > { %v3096_v33 = vpop.f32.mrf.mxu1 }
 0x1f1   : > { %v5923_v14 = vpop.f32.mrf.mxu1 }
 0x1f3   : > { %v3099_v49 = vpop.f32.mrf.mxu1 }
 0x1f8   : > { %v5925_v31 = vpop.f32.mrf.mxu0 }
 0x1fa   : > { %v3032_v24 = vpop.f32.mrf.mxu0 }
 0x1fc   : > { %v5927_v44 = vpop.f32.mrf.mxu0 }
 0x1fe   : > { %v3035_v19 = vpop.f32.mrf.mxu0 }
 0x206   : > { %v5929_v23 = vpop.f32.mrf.mxu1 }
 0x208   : > { %v3104_v3 = vpop.f32.mrf.mxu1 }
 0x20a   : > { %v5931_v25 = vpop.f32.mrf.mxu0  ;;  %v5933_v34 = vpop.f32.mrf.mxu1 }
 0x20c   : > { %v3040_v21 = vpop.f32.mrf.mxu0  ;;  %v3107_v32 = vpop.f32.mrf.mxu1 }
 0x20e   : > { %v5935_v5 = vpop.f32.mrf.mxu0  ;;  %v3227_v57 = vpop.f32.mrf.mxu1 }
 0x20f   : > { %v3228_v13 = vadd.f32 %v3227_v57, %v5849_v4 }
 0x210   : > { %v3043_v15 = vpop.f32.mrf.mxu0  ;;  %v3229_v52 = vpop.f32.mrf.mxu1 }
 0x212   : > { %v3709_v43 = vpop.f32.mrf.mxu0  ;;  %v3230_v59 = vpop.f32.mrf.mxu1 }
 0x213   : > { %v3836_v46 = vadd.f32 %v3709_v43, %v3228_v13  ;;  %v3231_v16 = vadd.f32 %v3230_v59, %v5856_v36 }
 0x214   : > { %v3711_v0 = vpop.f32.mrf.mxu0  ;;  %v3232_v4 = vpop.f32.mrf.mxu1 }
 0x215   : > { %v3875_v27 = vmul.f32 %v5941_v41, %v3836_v46 }
 0x216   : > { %v3712_v17 = vpop.f32.mrf.mxu0  ;;  %v3235_v29 = vpop.f32.mrf.mxu1 }
 0x217   : > { %v3914_v53 = vadd.f32 %v5947_v48, %v3875_v27  ;;  %v3837_v9 = vadd.f32 %v3712_v17, %v3231_v16  ;;  %v3236_v62 = vadd.f32 %v3235_v29, %v5863_v45 }
 0x218   : > { %v3714_v60 = vpop.f32.mrf.mxu0  ;;  %v3237_v40 = vpop.f32.mrf.mxu1 }
 0x219   : > { %v3946_v12 = vmax.f32 %v3914_v53, 0.0  ;;  %v3876_v36 = vmul.f32 %v5941_v41, %v3837_v9 }
 0x21a   : > { %v3717_v35 = vpop.f32.mrf.mxu0  ;;  %v3238_v50 = vpop.f32.mrf.mxu1 }
 0x21b   : > { %v4438_v6 = vpack.c.bf16 %v3946_v12, %v3946_v12  ;;  %v3915_v42 = vadd.f32 %v5947_v48, %v3876_v36  ;;  %v3838_v20 = vadd.f32 %v3717_v35, %v3236_v62  ;;  %v3239_v45 = vadd.f32 %v3238_v50, %v5870_v63 }
 0x21c   : > { %v3719_v33 = vpop.f32.mrf.mxu0  ;;  %v3240_v49 = vpop.f32.mrf.mxu1 }
 0x21d   : > { %4106 = vst.msk [vmem:[%s5958_s5] sm:$0xf] %vm1149_vm2, %v4438_v6  ;;  %v3947_v24 = vmax.f32 %v3915_v42, 0.0  ;;  %v3877_v19 = vmul.f32 %v5941_v41, %v3838_v20 }
 0x21e   : > { %v3720_v3 = vpop.f32.mrf.mxu0  ;;  %v3243_v21 = vpop.f32.mrf.mxu1 }
 0x21f   : > { %v4439_v32 = vpack.c.bf16 %v3947_v24, %v3947_v24  ;;  %v3916_v57 = vadd.f32 %v5947_v48, %v3877_v19  ;;  %v3839_v13 = vadd.f32 %v3720_v3, %v3239_v45  ;;  %v3244_v15 = vadd.f32 %v3243_v21, %v5877_v1 }
 0x220   : > { %v3722_v52 = vpop.f32.mrf.mxu0  ;;  %v3245_v43 = vpop.f32.mrf.mxu1 }
 0x221   : > { %4107 = vst.msk [vmem:[%s5958_s5 + $0x4] sm:$0xf] %vm1149_vm2, %v4439_v32  ;;  %v3948_v63 = vmax.f32 %v3916_v57, 0.0  ;;  %v3878_v59 = vmul.f32 %v5941_v41, %v3839_v13 }
 0x222   : > { %v3725_v46 = vpop.f32.mrf.mxu0  ;;  %v3246_v16 = vpop.f32.mrf.mxu1 }
 0x223   : > { %v4440_v0 = vpack.c.bf16 %v3948_v63, %v3948_v63  ;;  %v3917_v4 = vadd.f32 %v5947_v48, %v3878_v59  ;;  %v3840_v27 = vadd.f32 %v3725_v46, %v3244_v15  ;;  %v3247_v17 = vadd.f32 %v3246_v16, %v5884_v51 }
 0x224   : > { %v3727_v29 = vpop.f32.mrf.mxu0  ;;  %v3248_v53 = vpop.f32.mrf.mxu1 }
 0x225   : > { %4108 = vst.msk [vmem:[%s5958_s5 + $0x8] sm:$0xf] %vm1149_vm2, %v4440_v0  ;;  %v3949_v1 = vmax.f32 %v3917_v4, 0.0  ;;  %v3879_v9 = vmul.f32 %v5941_v41, %v3840_v27 }
 0x226   : > { %v3728_v62 = vpop.f32.mrf.mxu0  ;;  %v3251_v60 = vpop.f32.mrf.mxu1 }
 0x227   : > { %v4441_v40 = vpack.c.bf16 %v3949_v1, %v3949_v1  ;;  %v3918_v12 = vadd.f32 %v5947_v48, %v3879_v9  ;;  %v3841_v36 = vadd.f32 %v3728_v62, %v3247_v17  ;;  %v3252_v35 = vadd.f32 %v3251_v60, %v5889_v56 }
 0x228   : > { %v3730_v50 = vpop.f32.mrf.mxu0  ;;  %v3253_v6 = vpop.f32.mrf.mxu1 }
 0x229   : > { %4109 = vst.msk [vmem:[%s5958_s5 + $0xc] sm:$0xf] %vm1149_vm2, %v4441_v40  ;;  %v3950_v51 = vmax.f32 %v3918_v12, 0.0  ;;  %v3880_v42 = vmul.f32 %v5941_v41, %v3841_v36 }
 0x22a   : > { %v3733_v20 = vpop.f32.mrf.mxu0  ;;  %v3254_v45 = vpop.f32.mrf.mxu1 }
 0x22b   : > { %v4442_v33 = vpack.c.bf16 %v3950_v51, %v3950_v51  ;;  %v3919_v49 = vadd.f32 %v5947_v48, %v3880_v42  ;;  %v3842_v24 = vadd.f32 %v3733_v20, %v3252_v35  ;;  %v3255_v19 = vadd.f32 %v3254_v45, %v5894_v26 }
 0x22c   : > { %v3735_v3 = vpop.f32.mrf.mxu0  ;;  %v3256_v21 = vpop.f32.mrf.mxu1 }
 0x22d   : > { %4110 = vst.msk [vmem:[%s5958_s5 + $0x10] sm:$0xf] %vm1149_vm2, %v4442_v33  ;;  %v3951_v56 = vmax.f32 %v3919_v49, 0.0  ;;  %v3881_v32 = vmul.f32 %v5941_v41, %v3842_v24 }
 0x22e   : > { %v3736_v57 = vpop.f32.mrf.mxu0  ;;  %v3259_v13 = vpop.f32.mrf.mxu1 }
 0x22f   : > { %v4443_v15 = vpack.c.bf16 %v3951_v56, %v3951_v56  ;;  %v3920_v52 = vadd.f32 %v5947_v48, %v3881_v32  ;;  %v3843_v43 = vadd.f32 %v3736_v57, %v3255_v19  ;;  %v3260_v63 = vadd.f32 %v3259_v13, %v5909_v28 }
 0x230   : > { %v3738_v59 = vpop.f32.mrf.mxu0  ;;  %v3261_v46 = vpop.f32.mrf.mxu1 }
 0x231   : > { %4111 = vst.msk [vmem:[%s5958_s5 + $0x14] sm:$0xf] %vm1149_vm2, %v4443_v15  ;;  %v3952_v26 = vmax.f32 %v3920_v52, 0.0  ;;  %v3882_v16 = vmul.f32 %v5941_v41, %v3843_v43 }
 0x232   : > { %v3741_v0 = vpop.f32.mrf.mxu0  ;;  %v3262_v4 = vpop.f32.mrf.mxu1 }
 0x233   : > { %v4444_v27 = vpack.c.bf16 %v3952_v26, %v3952_v26  ;;  %v3921_v17 = vadd.f32 %v5947_v48, %v3882_v16  ;;  %v3844_v29 = vadd.f32 %v3741_v0, %v3260_v63  ;;  %v3263_v53 = vadd.f32 %v3262_v4, %v5911_v11 }
 0x234   : > { %v3743_v1 = vpop.f32.mrf.mxu0  ;;  %v3264_v9 = vpop.f32.mrf.mxu1 }
 0x235   : > { %4112 = vst.msk [vmem:[%s5958_s5 + $0x18] sm:$0xf] %vm1149_vm2, %v4444_v27  ;;  %v3953_v28 = vmax.f32 %v3921_v17, 0.0  ;;  %v3883_v62 = vmul.f32 %v5941_v41, %v3844_v29 }
 0x236   : > { %v3744_v60 = vpop.f32.mrf.mxu0  ;;  %v3267_v40 = vpop.f32.mrf.mxu1 }
 0x237   : > { %v4445_v12 = vpack.c.bf16 %v3953_v28, %v3953_v28  ;;  %v3922_v36 = vadd.f32 %v5947_v48, %v3883_v62  ;;  %v3845_v35 = vadd.f32 %v3744_v60, %v3263_v53  ;;  %v3268_v50 = vadd.f32 %v3267_v40, %v5917_v55 }
 0x238   : > { %v3746_v6 = vpop.f32.mrf.mxu0  ;;  %v3269_v51 = vpop.f32.mrf.mxu1 }
 0x239   : > { %4113 = vst.msk [vmem:[%s5958_s5 + $0x1c] sm:$0xf] %vm1149_vm2, %v4445_v12  ;;  %v3954_v11 = vmax.f32 %v3922_v36, 0.0  ;;  %v3884_v42 = vmul.f32 %v5941_v41, %v3845_v35 }
 0x23a   : > { %v3749_v20 = vpop.f32.mrf.mxu0  ;;  %v3270_v45 = vpop.f32.mrf.mxu1 }
 0x23b   : > { %v4446_v33 = vpack.c.bf16 %v3954_v11, %v3954_v11  ;;  %v3923_v49 = vadd.f32 %v5947_v48, %v3884_v42  ;;  %v3846_v24 = vadd.f32 %v3749_v20, %v3268_v50  ;;  %v3271_v19 = vadd.f32 %v3270_v45, %v5919_v30 }
 0x23c   : > { %v3751_v3 = vpop.f32.mrf.mxu0  ;;  %v3272_v21 = vpop.f32.mrf.mxu1 }
 0x23d   : > { %4114 = vst.msk [vmem:[%s5958_s5 + $0x20] sm:$0xf] %vm1149_vm2, %v4446_v33  ;;  %v3955_v55 = vmax.f32 %v3923_v49, 0.0  ;;  %v3885_v56 = vmul.f32 %v5941_v41, %v3846_v24 }
 0x23e   : > { %v3752_v32 = vpop.f32.mrf.mxu0  ;;  %v3275_v57 = vpop.f32.mrf.mxu1 }
 0x23f   : > { %v4447_v13 = vpack.c.bf16 %v3955_v55, %v3955_v55  ;;  %v3924_v15 = vadd.f32 %v5947_v48, %v3885_v56  ;;  %v3847_v52 = vadd.f32 %v3752_v32, %v3271_v19  ;;  %v3276_v43 = vadd.f32 %v3275_v57, %v5925_v31 }
 0x240   : > { %v3754_v63 = vpop.f32.mrf.mxu0  ;;  %v3277_v59 = vpop.f32.mrf.mxu1 }
 0x241   : > { %4115 = vst.msk [vmem:[%s5958_s5 + $0x24] sm:$0xf] %vm1149_vm2, %v4447_v13  ;;  %v3956_v30 = vmax.f32 %v3924_v15, 0.0  ;;  %v3886_v46 = vmul.f32 %v5941_v41, %v3847_v52 }
 0x242   : > { %v3757_v26 = vpop.f32.mrf.mxu0  ;;  %v3278_v16 = vpop.f32.mrf.mxu1 }
 0x243   : > { %v4448_v0 = vpack.c.bf16 %v3956_v30, %v3956_v30  ;;  %v3925_v4 = vadd.f32 %v5947_v48, %v3886_v46  ;;  %v3848_v27 = vadd.f32 %v3757_v26, %v3276_v43  ;;  %v3279_v17 = vadd.f32 %v3278_v16, %v5927_v44 }
 0x244   : > { %v3759_v29 = vpop.f32.mrf.mxu0  ;;  %v3280_v53 = vpop.f32.mrf.mxu1 }
 0x245   : > { %4116 = vst.msk [vmem:[%s5958_s5 + $0x28] sm:$0xf] %vm1149_vm2, %v4448_v0  ;;  %v3957_v31 = vmax.f32 %v3925_v4, 0.0  ;;  %v3887_v1 = vmul.f32 %v5941_v41, %v3848_v27 }
 0x246   : > { %v3760_v9 = vpop.f32.mrf.mxu0  ;;  %v3283_v28 = vpop.f32.mrf.mxu1 }
 0x247   : > { %v4449_v62 = vpack.c.bf16 %v3957_v31, %v3957_v31  ;;  %v3926_v60 = vadd.f32 %v5947_v48, %v3887_v1  ;;  %v3849_v40 = vadd.f32 %v3760_v9, %v3279_v17  ;;  %v3284_v12 = vadd.f32 %v3283_v28, %v5931_v25 }
 0x248   : > { %v3762_v36 = vpop.f32.mrf.mxu0  ;;  %v3285_v35 = vpop.f32.mrf.mxu1 }
 0x249   : > { %4117 = vst.msk [vmem:[%s5958_s5 + $0x2c] sm:$0xf] %vm1149_vm2, %v4449_v62  ;;  %v3958_v44 = vmax.f32 %v3926_v60, 0.0  ;;  %v3888_v50 = vmul.f32 %v5941_v41, %v3849_v40 }
 0x24a   : > { %v3765_v6 = vpop.f32.mrf.mxu0  ;;  %v3286_v51 = vpop.f32.mrf.mxu1 }
 0x24b   : > { %v4450_v11 = vpack.c.bf16 %v3958_v44, %v3958_v44  ;;  %v3927_v42 = vadd.f32 %v5947_v48, %v3888_v50  ;;  %v3850_v20 = vadd.f32 %v3765_v6, %v3284_v12  ;;  %v3287_v45 = vadd.f32 %v3286_v51, %v5935_v5 }
 0x24c   : > { %v3767_v33 = vpop.f32.mrf.mxu0  ;;  %v3288_v49 = vpop.f32.mrf.mxu1 }
 0x24d   : > { %4118 = vst.msk [vmem:[%s5958_s5 + $0x30] sm:$0xf] %vm1149_vm2, %v4450_v11  ;;  %v3959_v25 = vmax.f32 %v3927_v42, 0.0  ;;  %v3889_v24 = vmul.f32 %v5941_v41, %v3850_v20 }
 0x24e   : > { %v3768_v19 = vpop.f32.mrf.mxu0  ;;  %v3291_v3 = vpop.f32.mrf.mxu1 }
 0x24f   : > { %v4451_v21 = vpack.c.bf16 %v3959_v25, %v3959_v25  ;;  %v3928_v55 = vadd.f32 %v5947_v48, %v3889_v24  ;;  %v3851_v56 = vadd.f32 %v3768_v19, %v3287_v45  ;;  %v3292_v32 = vadd.f32 %v3291_v3, %v5835_v10 }
 0x250   : > { %v3770_v57 = vpop.f32.mrf.mxu0  ;;  %v3293_v13 = vpop.f32.mrf.mxu1 }
 0x251   : > { %4119 = vst.msk [vmem:[%s5958_s5 + $0x34] sm:$0xf] %vm1149_vm2, %v4451_v21  ;;  %v3960_v5 = vmax.f32 %v3928_v55, 0.0  ;;  %v3890_v15 = vmul.f32 %v5941_v41, %v3851_v56 }
 0x252   : > { %v3773_v52 = vpop.f32.mrf.mxu0  ;;  %v3294_v43 = vpop.f32.mrf.mxu1 }
 0x253   : > { %v4452_v63 = vpack.c.bf16 %v3960_v5, %v3960_v5  ;;  %v3929_v59 = vadd.f32 %v5947_v48, %v3890_v15  ;;  %v3852_v30 = vadd.f32 %v3773_v52, %v3292_v32  ;;  %v3295_v46 = vadd.f32 %v3294_v43, %v5840_v38 }
 0x254   : > { %v3775_v26 = vpop.f32.mrf.mxu0  ;;  %v3296_v16 = vpop.f32.mrf.mxu1 }
 0x255   : > { %4120 = vst.msk [vmem:[%s5958_s5 + $0x38] sm:$0xf] %vm1149_vm2, %v4452_v63  ;;  %v3961_v10 = vmax.f32 %v3929_v59, 0.0  ;;  %v3891_v0 = vmul.f32 %v5941_v41, %v3852_v30 }
 0x256   : > { %v3776_v4 = vpop.f32.mrf.mxu0  ;;  %v3299_v27 = vpop.f32.mrf.mxu1 }
 0x257   : > { %v4453_v17 = vpack.c.bf16 %v3961_v10, %v3961_v10  ;;  %v3930_v29 = vadd.f32 %v5947_v48, %v3891_v0  ;;  %v3853_v53 = vadd.f32 %v3776_v4, %v3295_v46  ;;  %v3300_v31 = vadd.f32 %v3299_v27, %v5845_v47 }
 0x258   : > { %v3778_v1 = vpop.f32.mrf.mxu0  ;;  %v3301_v9 = vpop.f32.mrf.mxu1 }
 0x259   : > { %4121 = vst.msk [vmem:[%s5958_s5 + $0x3c] sm:$0xf] %vm1149_vm2, %v4453_v17  ;;  %v3962_v38 = vmax.f32 %v3930_v29, 0.0  ;;  %v3892_v28 = vmul.f32 %v5941_v41, %v3853_v53 }
 0x25a   : > { %v3781_v62 = vpop.f32.mrf.mxu0  ;;  %v3302_v60 = vpop.f32.mrf.mxu1 }
 0x25b   : > { %v4454_v40 = vpack.c.bf16 %v3962_v38, %v3962_v38  ;;  %v3931_v12 = vadd.f32 %v5947_v48, %v3892_v28  ;;  %v3854_v36 = vadd.f32 %v3781_v62, %v3300_v31  ;;  %v3303_v35 = vadd.f32 %v3302_v60, %v5852_v61 }
 0x25c   : > { %v3783_v44 = vpop.f32.mrf.mxu0  ;;  %v3304_v50 = vpop.f32.mrf.mxu1 }
 0x25d   : > { %4122 = vst.msk [vmem:[%s5958_s5 + $0x40] sm:$0xf] %vm1149_vm2, %v4454_v40  ;;  %v3963_v47 = vmax.f32 %v3931_v12, 0.0  ;;  %v3893_v6 = vmul.f32 %v5941_v41, %v3854_v36 }
 0x25e   : > { %v3784_v51 = vpop.f32.mrf.mxu0  ;;  %v3307_v11 = vpop.f32.mrf.mxu1 }
 0x25f   : > { %v4455_v42 = vpack.c.bf16 %v3963_v47, %v3963_v47  ;;  %v3932_v20 = vadd.f32 %v5947_v48, %v3893_v6  ;;  %v3855_v45 = vadd.f32 %v3784_v51, %v3303_v35  ;;  %v3308_v33 = vadd.f32 %v3307_v11, %v5859_v22 }
 0x260   : > { %v3786_v49 = vpop.f32.mrf.mxu0  ;;  %v3309_v25 = vpop.f32.mrf.mxu1 }
 0x261   : > { %4123 = vst.msk [vmem:[%s5958_s5 + $0x44] sm:$0xf] %vm1149_vm2, %v4455_v42  ;;  %v3964_v61 = vmax.f32 %v3932_v20, 0.0  ;;  %v3894_v24 = vmul.f32 %v5941_v41, %v3855_v45 }
 0x262   : > { %v3789_v19 = vpop.f32.mrf.mxu0  ;;  %v3310_v3 = vpop.f32.mrf.mxu1 }
 0x263   : > { %v4456_v21 = vpack.c.bf16 %v3964_v61, %v3964_v61  ;;  %v3933_v55 = vadd.f32 %v5947_v48, %v3894_v24  ;;  %v3856_v56 = vadd.f32 %v3789_v19, %v3308_v33  ;;  %v3311_v32 = vadd.f32 %v3310_v3, %v5866_v58 }
 0x264   : > { %v3791_v57 = vpop.f32.mrf.mxu0  ;;  %v3312_v13 = vpop.f32.mrf.mxu1 }
 0x265   : > { %4124 = vst.msk [vmem:[%s5958_s5 + $0x48] sm:$0xf] %vm1149_vm2, %v4456_v21  ;;  %v3965_v22 = vmax.f32 %v3933_v55, 0.0  ;;  %v3895_v5 = vmul.f32 %v5941_v41, %v3856_v56 }
 0x266   : > { %v3792_v15 = vpop.f32.mrf.mxu0  ;;  %v3315_v52 = vpop.f32.mrf.mxu1 }
 0x267   : > { %v4457_v43 = vpack.c.bf16 %v3965_v22, %v3965_v22  ;;  %v3934_v63 = vadd.f32 %v5947_v48, %v3895_v5  ;;  %v3857_v59 = vadd.f32 %v3792_v15, %v3311_v32  ;;  %v3316_v30 = vadd.f32 %v3315_v52, %v5873_v39 }
 0x268   : > { %v3794_v46 = vpop.f32.mrf.mxu0  ;;  %v3317_v26 = vpop.f32.mrf.mxu1 }
 0x269   : > { %4125 = vst.msk [vmem:[%s5958_s5 + $0x4c] sm:$0xf] %vm1149_vm2, %v4457_v43  ;;  %v3966_v58 = vmax.f32 %v3934_v63, 0.0  ;;  %v3896_v16 = vmul.f32 %v5941_v41, %v3857_v59 }
 0x26a   : > { %v3797_v10 = vpop.f32.mrf.mxu0  ;;  %v3318_v0 = vpop.f32.mrf.mxu1 }
 0x26b   : > { %v4458_v4 = vpack.c.bf16 %v3966_v58, %v3966_v58  ;;  %v3935_v27 = vadd.f32 %v5947_v48, %v3896_v16  ;;  %v3858_v17 = vadd.f32 %v3797_v10, %v3316_v30  ;;  %v3319_v29 = vadd.f32 %v3318_v0, %v5880_v54 }
 0x26c   : > { %v3799_v53 = vpop.f32.mrf.mxu0  ;;  %v3320_v31 = vpop.f32.mrf.mxu1 }
 0x26d   : > { %4126 = vst.msk [vmem:[%s5958_s5 + $0x50] sm:$0xf] %vm1149_vm2, %v4458_v4  ;;  %v3967_v39 = vmax.f32 %v3935_v27, 0.0  ;;  %v3897_v1 = vmul.f32 %v5941_v41, %v3858_v17 }
 0x26e   : > { %v3800_v9 = vpop.f32.mrf.mxu0  ;;  %v3323_v38 = vpop.f32.mrf.mxu1 }
 0x26f   : > { %v4459_v28 = vpack.c.bf16 %v3967_v39, %v3967_v39  ;;  %v3936_v62 = vadd.f32 %v5947_v48, %v3897_v1  ;;  %v3859_v60 = vadd.f32 %v3800_v9, %v3319_v29  ;;  %v3324_v40 = vadd.f32 %v3323_v38, %v5902_v8 }
 0x270   : > { %v3802_v12 = vpop.f32.mrf.mxu0  ;;  %v3325_v36 = vpop.f32.mrf.mxu1 }
 0x271   : > { %4127 = vst.msk [vmem:[%s5958_s5 + $0x54] sm:$0xf] %vm1149_vm2, %v4459_v28  ;;  %v3968_v54 = vmax.f32 %v3936_v62, 0.0  ;;  %v3898_v35 = vmul.f32 %v5941_v41, %v3859_v60 }
 0x272   : > { %v3805_v44 = vpop.f32.mrf.mxu0  ;;  %v3326_v50 = vpop.f32.mrf.mxu1 }
 0x273   : > { %v4460_v47 = vpack.c.bf16 %v3968_v54, %v3968_v54  ;;  %v3937_v6 = vadd.f32 %v5947_v48, %v3898_v35  ;;  %v3860_v51 = vadd.f32 %v3805_v44, %v3324_v40  ;;  %v3327_v11 = vadd.f32 %v3326_v50, %v5906_v37 }
 0x274   : > { %v3807_v42 = vpop.f32.mrf.mxu0  ;;  %v3328_v20 = vpop.f32.mrf.mxu1 }
 0x275   : > { %4128 = vst.msk [vmem:[%s5958_s5 + $0x58] sm:$0xf] %vm1149_vm2, %v4460_v47  ;;  %v3969_v8 = vmax.f32 %v3937_v6, 0.0  ;;  %v3899_v45 = vmul.f32 %v5941_v41, %v3860_v51 }
 0x276   : > { %v3808_v33 = vpop.f32.mrf.mxu0  ;;  %v3331_v49 = vpop.f32.mrf.mxu1 }
 0x277   : > { %v4461_v25 = vpack.c.bf16 %v3969_v8, %v3969_v8  ;;  %v3938_v61 = vadd.f32 %v5947_v48, %v3899_v45  ;;  %v3861_v24 = vadd.f32 %v3808_v33, %v3327_v11  ;;  %v3332_v19 = vadd.f32 %v3331_v49, %v5913_v2 }
 0x278   : > { %v3810_v3 = vpop.f32.mrf.mxu0  ;;  %v3333_v21 = vpop.f32.mrf.mxu1 }
 0x279   : > { %4129 = vst.msk [vmem:[%s5958_s5 + $0x5c] sm:$0xf] %vm1149_vm2, %v4461_v25  ;;  %v3970_v37 = vmax.f32 %v3938_v61, 0.0  ;;  %v3900_v55 = vmul.f32 %v5941_v41, %v3861_v24 }
 0x27a   : > { %v3813_v56 = vpop.f32.mrf.mxu0  ;;  %v3334_v32 = vpop.f32.mrf.mxu1 }
 0x27b   : > { %v4462_v57 = vpack.c.bf16 %v3970_v37, %v3970_v37  ;;  %v3939_v13 = vadd.f32 %v5947_v48, %v3900_v55  ;;  %v3862_v22 = vadd.f32 %v3813_v56, %v3332_v19  ;;  %v3335_v5 = vadd.f32 %v3334_v32, %v5915_v18 }
 0x27c   : > { %v3815_v15 = vpop.f32.mrf.mxu0  ;;  %v3336_v52 = vpop.f32.mrf.mxu1 }
 0x27d   : > { %4130 = vst.msk [vmem:[%s5958_s5 + $0x60] sm:$0xf] %vm1149_vm2, %v4462_v57  ;;  %v3971_v2 = vmax.f32 %v3939_v13, 0.0  ;;  %v3901_v43 = vmul.f32 %v5941_v41, %v3862_v22 }
 0x27e   : > { %v3816_v63 = vpop.f32.mrf.mxu0  ;;  %v3339_v59 = vpop.f32.mrf.mxu1 }
 0x27f   : > { %v4463_v30 = vpack.c.bf16 %v3971_v2, %v3971_v2  ;;  %v3940_v46 = vadd.f32 %v5947_v48, %v3901_v43  ;;  %v3863_v26 = vadd.f32 %v3816_v63, %v3335_v5  ;;  %v3340_v58 = vadd.f32 %v3339_v59, %v5921_v7 }
 0x280   : > { %v3818_v16 = vpop.f32.mrf.mxu0  ;;  %v3341_v10 = vpop.f32.mrf.mxu1 }
 0x281   : > { %4131 = vst.msk [vmem:[%s5958_s5 + $0x64] sm:$0xf] %vm1149_vm2, %v4463_v30  ;;  %v3972_v18 = vmax.f32 %v3940_v46, 0.0  ;;  %v3902_v0 = vmul.f32 %v5941_v41, %v3863_v26 }
 0x282   : > { %v3821_v4 = vpop.f32.mrf.mxu0  ;;  %v3342_v27 = vpop.f32.mrf.mxu1 }
 0x283   : > { %v4464_v17 = vpack.c.bf16 %v3972_v18, %v3972_v18  ;;  %v3941_v29 = vadd.f32 %v5947_v48, %v3902_v0  ;;  %v3864_v53 = vadd.f32 %v3821_v4, %v3340_v58  ;;  %v3343_v31 = vadd.f32 %v3342_v27, %v5923_v14 }
 0x284   : > { %v3823_v39 = vpop.f32.mrf.mxu0  ;;  %v3344_v1 = vpop.f32.mrf.mxu1 }
 0x285   : > { %4132 = vst.msk [vmem:[%s5958_s5 + $0x68] sm:$0xf] %vm1149_vm2, %v4464_v17  ;;  %v3973_v7 = vmax.f32 %v3941_v29, 0.0  ;;  %v3903_v9 = vmul.f32 %v5941_v41, %v3864_v53 }
 0x286   : > { %v3824_v38 = vpop.f32.mrf.mxu0  ;;  %v3347_v28 = vpop.f32.mrf.mxu1 }
 0x287   : > { %v4465_v62 = vpack.c.bf16 %v3973_v7, %v3973_v7  ;;  %v3942_v60 = vadd.f32 %v5947_v48, %v3903_v9  ;;  %v3865_v40 = vadd.f32 %v3824_v38, %v3343_v31  ;;  %v3348_v12 = vadd.f32 %v3347_v28, %v5929_v23 }
 0x288   : > { %v3826_v36 = vpop.f32.mrf.mxu0  ;;  %v3349_v54 = vpop.f32.mrf.mxu1 }
 0x289   : > { %4133 = vst.msk [vmem:[%s5958_s5 + $0x6c] sm:$0xf] %vm1149_vm2, %v4465_v62  ;;  %v3974_v14 = vmax.f32 %v3942_v60, 0.0  ;;  %v3904_v35 = vmul.f32 %v5941_v41, %v3865_v40 }
 0x28a   : > { %v3829_v44 = vpop.f32.mrf.mxu0  ;;  %v3350_v50 = vpop.f32.mrf.mxu1 }
 0x28b   : > { %v4466_v47 = vpack.c.bf16 %v3974_v14, %v3974_v14  ;;  %v3943_v6 = vadd.f32 %v5947_v48, %v3904_v35  ;;  %v3866_v51 = vadd.f32 %v3829_v44, %v3348_v12  ;;  %v3351_v11 = vadd.f32 %v3350_v50, %v5933_v34 }
 0x28c   : > { %v3831_v42 = vpop.f32.mrf.mxu0  ;;  %v3352_v20 = vpop.f32.mrf.mxu1 }
 0x28d   : > { %4134 = vst.msk [vmem:[%s5958_s5 + $0x70] sm:$0xf] %vm1149_vm2, %v4466_v47  ;;  %v3975_v23 = vmax.f32 %v3943_v6, 0.0  ;;  %v3905_v8 = vmul.f32 %v5941_v41, %v3866_v51 }
 0x28e   : > { %v3832_v45 = vpop.f32.mrf.mxu0 }
 0x28f   : > { %v4467_v33 = vpack.c.bf16 %v3975_v23, %v3975_v23  ;;  %v3944_v49 = vadd.f32 %v5947_v48, %v3905_v8  ;;  %v3867_v25 = vadd.f32 %v3832_v45, %v3351_v11 }
 0x290   : > { %v3834_v61 = vpop.f32.mrf.mxu0 }
 0x291   : > { %4135 = vst.msk [vmem:[%s5958_s5 + $0x74] sm:$0xf] %vm1149_vm2, %v4467_v33  ;;  %v3976_v24 = vmax.f32 %v3944_v49, 0.0  ;;  %v3906_v34 = vmul.f32 %v5941_v41, %v3867_v25 }
 0x293   : > { %v4468_v19 = vpack.c.bf16 %v3976_v24, %v3976_v24  ;;  %v3945_v3 = vadd.f32 %v5947_v48, %v3906_v34 }
 0x295   : > { %4136 = vst.msk [vmem:[%s5958_s5 + $0x78] sm:$0xf] %vm1149_vm2, %v4468_v19  ;;  %v3977_v21 = vmax.f32 %v3945_v3, 0.0 }
 0x297   : > { %v4469_v37 = vpack.c.bf16 %v3977_v21, %v3977_v21 }
 0x299   : > { %4137 = vst.msk [vmem:[%s5958_s5 + $0x7c] sm:$0xf] %vm1149_vm2, %v4469_v37 }
 0x29a PF: > { %s14_s15 = sadd.s32 1, %s4591_s15  }
 0x29b   : > { %p11_p4 = scmp.ge.s32.totalorder %s14_s15, 4  }
 0x29d   :  { %13 = sbr.rel (!%p11_p4) target bundleno = 1 (0x1), region = 68 }

</bundles_post_ra>
